<compile_context>
chip_gen: v7x
topology: tpu7x:2x2x1
jax: 0.10.0
libtpu: 0.0.40
codegen_flags: <defaults>
</compile_context>

<pallas_src>
import math

import jax
import jax.numpy as jnp
from jax.experimental import pallas as pl
from jax.experimental.pallas import tpu as pltpu


def gcn_kernel(xt_ref, row_ref, alpha_ref, adj_ref,
               wvi_rep_ref, expand_ref, walpha_bd_ref, wnode_rep_ref,
               newx_ref, newalpha_ref):
    """One (batch b, row-tile i) grid step.  All 2-D, lane-dense, f32 compute."""
    f32 = jnp.float32
    x_tile = xt_ref[0].astype(f32)       # (TN, D)    x rows of this i-tile
    row = row_ref[0].astype(f32)         # (1, N*D)   x[b] @ w_vj + bias_h (lane-dense)
    alpha_d = alpha_ref[0].astype(f32)   # (TN, N*D)  alpha[b, i-tile] (lane-dense)
    adj_t = adj_ref[0].astype(f32)       # (TN, N)

    # xi_rep[t, j*D+d] = (x[t] @ w_vi)[d] via one MXU matmul with tile(w_vi,(1,N)).
    xi_rep = jnp.dot(x_tile, wvi_rep_ref[...], preferred_element_type=f32)   # (TN, N*D)

    # H[t, j*D+d] = relu(x_i W_vi + x_j W_vj + alpha + bias_h)
    h = jax.nn.relu(xi_rep + row + alpha_d)                                  # (TN, N*D)

    # new_alpha = relu(H @ w_alpha) per (i, j): lane-dense MXU matmul against
    # the block-diagonal kron(I_N, w_alpha).
    new_alpha = jax.nn.relu(
        jnp.dot(h, walpha_bd_ref[...], preferred_element_type=f32))          # (TN, N*K)

    # AH[t, d] = sum_j adj[t, j] * H[t, j, d] via MXU (no XLU sublane reduce):
    # adj_rep[t, j*D+d] = adj[t, j];  new_x = relu((adj_rep*H) @ tile(w_node,(N,1))).
    adj_rep = jnp.dot(adj_t, expand_ref[...], preferred_element_type=f32)    # (TN, N*D)
    new_x = jax.nn.relu(
        jnp.dot(adj_rep * h, wnode_rep_ref[...], preferred_element_type=f32))  # (TN, K)

    newx_ref[0] = new_x.astype(newx_ref.dtype)
    newalpha_ref[0] = new_alpha.astype(newalpha_ref.dtype)


def _vmem_budgets():
    """(scoped vmem_limit_bytes request, working-set budget for tile picking)."""
    cap = 64 * 1024 * 1024            # conservative default (v7x per-TC VMEM)
    try:
        info = pltpu.get_tpu_info()
        cap = int(getattr(info, "vmem_capacity_bytes", cap) or cap)
    except Exception:
        pass
    # ~96 MiB scoped on 128-MiB parts (v5e/v6e), ~48 MiB on 64-MiB v7x.
    limit = min((cap * 3) // 4, 100 * 1024 * 1024)
    budget = max(limit - 8 * 1024 * 1024, 8 * 1024 * 1024)   # compiler-scratch headroom
    return limit, budget


def _pick_row_tile(N, D, K, a_in_size, adj_size, a_out_size, x_out_size,
                   fixed_bytes, budget):
    """Largest row tile TN (multiple of 8 dividing N, or N itself) that fits VMEM."""
    ND, NK = N * D, N * K
    budget = max(budget - fixed_bytes, 1 << 20)
    cands = sorted({N} | {t for t in range(8, N, 8) if N % t == 0}, reverse=True)

    def per_step(tn):
        io = 2 * tn * (ND * a_in_size      # alpha in-block (double-buffered)
                       + NK * a_out_size   # new_alpha out-block
                       + N * adj_size      # adj in-block
                       + D * 4             # x tile in-block
                       + K * x_out_size)   # new_x out-block
        # Live f32 temporaries: alpha/adj upcasts, xi_rep, h, adj_rep, adj_rep*h,
        # new_alpha and new_x before downcast.
        temps = tn * 4 * (5 * ND + NK + N + K)
        return io + temps

    for tn in cands:
        if per_step(tn) <= budget:
            return tn
    # Best effort: smallest candidate.  TODO(synk): add a j-tiled (TN, TJ*D)
    # formulation so very large N does not have to over-budget here.
    return cands[-1]


def gcn_layer_pallas(x, alpha, adj, box_num, params, *,
                     alpha_out_dtype=jnp.bfloat16, x_out_dtype=None,
                     single_buffer_consts=True):
    """GCNLayer forward.

    box_num is accepted for interface parity only (the PyTorch forward never
    reads it).  alpha/adj are streamed at the dtype the caller provides (pass
    them bf16 to halve those HBM reads); new_alpha is emitted in
    alpha_out_dtype (default bf16, None -> alpha.dtype), new_x in x_out_dtype
    (None -> x.dtype)."""
    del box_num
    B, N, D = x.shape
    K = params["w_node"].shape[1]
    ND, NK = N * D, N * K
    f32 = jnp.float32
    x_out_dt = jnp.dtype(x.dtype if x_out_dtype is None else x_out_dtype)
    a_out_dt = jnp.dtype(alpha.dtype if alpha_out_dtype is None else alpha_out_dtype)

    # ---- HBM-side layout plumbing (metadata-only; no dtype pre-casts) -------
    alpha_d = alpha.reshape(B, N, ND)            # lane-dense (j, d) -> N*D
    # x_j projection + bias hoisted out of the kernel: tiny B*N*D^2 XLA op,
    # i-invariant, and it removes the O((N*D)^2) kron(I, w_vj) constant.
    row = (jnp.einsum("bnd,dk->bnk", x.astype(f32), params["w_vj"].astype(f32))
           + params["bias_h"].astype(f32)).reshape(B, 1, ND)

    # ---- small structured constant weights -----------------------------------
    eye = jnp.eye(N, dtype=f32)
    w_vi_rep = jnp.tile(params["w_vi"].astype(f32), (1, N))        # (D, N*D)
    expand = jnp.kron(eye, jnp.ones((1, D), f32))                  # (N, N*D)
    w_alpha_bd = jnp.kron(eye, params["w_alpha"].astype(f32))      # (N*D, N*K)
    w_node_rep = jnp.tile(params["w_node"].astype(f32), (N, 1))    # (N*D, K)

    vmem_limit, tile_budget = _vmem_budgets()
    # Constants counted at 2x (worst case: double-buffered); row block is tiny.
    fixed_bytes = 2 * 4 * (D * ND + N * ND + ND * NK + ND * K + ND)
    TN = _pick_row_tile(N, D, K,
                        jnp.dtype(alpha_d.dtype).itemsize,
                        jnp.dtype(adj.dtype).itemsize,
                        a_out_dt.itemsize, x_out_dt.itemsize,
                        fixed_bytes, tile_budget)

    grid = (B, pl.cdiv(N, TN))

    def run(single_buffer):
        def const_spec(shape):
            if single_buffer:
                # Constants never change block index; one buffer is enough.
                return pl.BlockSpec(shape, lambda b, i: (0, 0),
                                    pipeline_mode=pl.Buffered(1))
            return pl.BlockSpec(shape, lambda b, i: (0, 0))

        grid_spec = pltpu.PrefetchScalarGridSpec(
            num_scalar_prefetch=0,
            grid=grid,
            in_specs=[
                pl.BlockSpec((1, TN, D), lambda b, i: (b, i, 0)),    # x rows of tile
                pl.BlockSpec((1, 1, ND), lambda b, i: (b, 0, 0)),    # x[b]@w_vj + bias
                pl.BlockSpec((1, TN, ND), lambda b, i: (b, i, 0)),   # alpha (lane-dense)
                pl.BlockSpec((1, TN, N), lambda b, i: (b, i, 0)),    # adj rows
                const_spec((D, ND)),                                 # tile(w_vi, (1, N))
                const_spec((N, ND)),                                 # adj lane expander
                const_spec((ND, NK)),                                # kron(I, w_alpha)
                const_spec((ND, K)),                                 # tile(w_node, (N, 1))
            ],
            out_specs=[
                pl.BlockSpec((1, TN, K), lambda b, i: (b, i, 0)),    # new_x
                pl.BlockSpec((1, TN, NK), lambda b, i: (b, i, 0)),   # new_alpha
            ],
        )
        return pl.pallas_call(
            gcn_kernel,
            out_shape=(jax.ShapeDtypeStruct((B, N, K), x_out_dt),
                       jax.ShapeDtypeStruct((B, N, NK), a_out_dt)),
            grid_spec=grid_spec,
            compiler_params=pltpu.CompilerParams(
                dimension_semantics=("parallel", "parallel"),
                vmem_limit_bytes=vmem_limit),
        )(x, row, alpha_d, adj, w_vi_rep, expand, w_alpha_bd, w_node_rep)

    if single_buffer_consts:
        try:
            new_x, new_alpha_d = run(True)
        except Exception:
            # pipeline_mode / Buffered(1) unsupported by this jax version: fall
            # back to default double buffering (correctness is unaffected).
            new_x, new_alpha_d = run(False)
    else:
        new_x, new_alpha_d = run(False)

    return new_x, new_alpha_d.reshape(B, N, N, K)


def init_params(key, in_dim, out_dim):
    """Deterministic init mirroring the module's __init__.

    kaiming_uniform_(a=sqrt(5)) on a 2-D (rows, cols) tensor gives
    bound = sqrt(1 / fan_in) with fan_in = cols; bias_h ~ U(0, 1)."""
    k = jax.random.split(key, 5)

    def kaiming(rng, shape):
        bound = math.sqrt(1.0 / shape[1])
        return jax.random.uniform(rng, shape, jnp.float32, -bound, bound)

    return {
        "w_alpha": kaiming(k[0], (in_dim, out_dim)),
        "w_vi": kaiming(k[1], (in_dim, in_dim)),
        "w_vj": kaiming(k[2], (in_dim, in_dim)),
        "bias_h": jax.random.uniform(k[3], (in_dim,), jnp.float32, 0.0, 1.0),
        "w_node": kaiming(k[4], (in_dim, out_dim)),
    }


def gcn_layer_ref(x, alpha, adj, params):
    """Pure-JAX reference of the PyTorch forward (for verification)."""
    xi = jnp.einsum("bid,dk->bik", x, params["w_vi"])
    xj = jnp.einsum("bjd,dk->bjk", x, params["w_vj"])
    H = jax.nn.relu(xi[:, :, None, :] + xj[:, None, :, :] + alpha
                    + params["bias_h"][None, None, None, :])
    AH = jnp.einsum("bij,bijd->bid", adj, H)
    new_x = jax.nn.relu(jnp.einsum("bid,dk->bik", AH, params["w_node"]))
    new_alpha = jax.nn.relu(jnp.einsum("bijd,dk->bijk", H, params["w_alpha"]))
    return new_x, new_alpha


if __name__ == "__main__":
    B, N, IN_DIM, OUT_DIM = 2, 8, 32, 16

    key = jax.random.PRNGKey(0)
    kx, ka, kadj, kp = jax.random.split(key, 4)

    x = jax.random.normal(kx, (B, N, IN_DIM), jnp.float32)
    alpha = jax.random.normal(ka, (B, N, N, IN_DIM), jnp.float32)
    adj = (jax.random.uniform(kadj, (B, N, N)) > 0.5).astype(jnp.float32)
    box_num = jnp.full((B,), N, jnp.int32)   # unused by the forward; parity only
    params = init_params(kp, IN_DIM, OUT_DIM)

    ref_x, ref_alpha = gcn_layer_ref(x, alpha, adj, params)

    # Default path: f32 alpha streamed as-is (no wrapper cast), bf16 new_alpha out.
    new_x, new_alpha = gcn_layer_pallas(x, alpha, adj, box_num, params)
    jax.block_until_ready((new_x, new_alpha))
    assert new_alpha.dtype == jnp.bfloat16
    assert jnp.allclose(new_x, ref_x, atol=1e-3, rtol=1e-3)
    assert jnp.allclose(new_alpha.astype(jnp.float32), ref_alpha, atol=5e-2, rtol=5e-2)

    # Bit-faithful f32 I/O path against the exact f32 reference.
    new_x32, new_alpha32 = gcn_layer_pallas(x, alpha, adj, box_num, params,
                                            alpha_out_dtype=jnp.float32)
    jax.block_until_ready((new_x32, new_alpha32))
    assert jnp.allclose(new_x32, ref_x, atol=1e-3, rtol=1e-3)
    assert jnp.allclose(new_alpha32, ref_alpha, atol=1e-3, rtol=1e-3)

    # Chained-layer path: alpha already bf16 at the API boundary (no wrapper cast).
    alpha_bf16 = alpha.astype(jnp.bfloat16)
    new_xb, new_alphab = gcn_layer_pallas(x, alpha_bf16, adj, box_num, params)
    jax.block_until_ready((new_xb, new_alphab))
    ref_xb, ref_alphab = gcn_layer_ref(x, alpha_bf16.astype(jnp.float32), adj, params)
    assert jnp.allclose(new_xb, ref_xb, atol=1e-3, rtol=1e-3)
    assert jnp.allclose(new_alphab.astype(jnp.float32), ref_alphab, atol=5e-2, rtol=5e-2)

    print("KERNEL_OK")
</pallas_src>

<mosaic_0001>
module attributes {stable_mosaic.version = 11 : i64} {
  func.func @gcn_kernel(%arg0: i32, %arg1: i32, %arg2: memref<1x8x32xf32, #tpu.memory_space<vmem>>, %arg3: memref<1x1x256xf32, #tpu.memory_space<vmem>>, %arg4: memref<1x8x256xf32, #tpu.memory_space<vmem>>, %arg5: memref<1x8x8xf32, #tpu.memory_space<vmem>>, %arg6: memref<32x256xf32, #tpu.memory_space<vmem>>, %arg7: memref<8x256xf32, #tpu.memory_space<vmem>>, %arg8: memref<256x128xf32, #tpu.memory_space<vmem>>, %arg9: memref<256x16xf32, #tpu.memory_space<vmem>>, %arg10: memref<1x8x16xf32, #tpu.memory_space<vmem>>, %arg11: memref<1x8x128xbf16, #tpu.memory_space<vmem>>) attributes {dimension_semantics = [#tpu.dimension_semantics<parallel>, #tpu.dimension_semantics<parallel>], iteration_bounds = array<i64: 2, 1>, scalar_prefetch = 0 : i64, scratch_operands = 0 : i64, tpu.core_type = #tpu.core_type<tc>, window_params = [{transform_indices = @transform_0, window_bounds = array<i64: 1, 8, 32>}, {transform_indices = @transform_1, window_bounds = array<i64: 1, 1, 256>}, {transform_indices = @transform_2, window_bounds = array<i64: 1, 8, 256>}, {transform_indices = @transform_3, window_bounds = array<i64: 1, 8, 8>}, {pipeline_mode = #tpu.pipeline_mode<synchronous>, transform_indices = @transform_4, window_bounds = array<i64: 32, 256>}, {pipeline_mode = #tpu.pipeline_mode<synchronous>, transform_indices = @transform_5, window_bounds = array<i64: 8, 256>}, {pipeline_mode = #tpu.pipeline_mode<synchronous>, transform_indices = @transform_6, window_bounds = array<i64: 256, 128>}, {pipeline_mode = #tpu.pipeline_mode<synchronous>, transform_indices = @transform_7, window_bounds = array<i64: 256, 16>}, {transform_indices = @transform_8, window_bounds = array<i64: 1, 8, 16>}, {transform_indices = @transform_9, window_bounds = array<i64: 1, 8, 128>}]} {
    %c0 = arith.constant 0 : index
    %c0_0 = arith.constant 0 : index
    %c0_1 = arith.constant 0 : index
    %0 = vector.load %arg2[%c0, %c0_0, %c0_1] : memref<1x8x32xf32, #tpu.memory_space<vmem>>, vector<1x8x32xf32>
    %1 = vector.shape_cast %0 : vector<1x8x32xf32> to vector<8x32xf32>
    %c0_2 = arith.constant 0 : index
    %c0_3 = arith.constant 0 : index
    %c0_4 = arith.constant 0 : index
    %2 = vector.load %arg3[%c0_2, %c0_3, %c0_4] : memref<1x1x256xf32, #tpu.memory_space<vmem>>, vector<1x1x256xf32>
    %3 = vector.shape_cast %2 : vector<1x1x256xf32> to vector<1x256xf32>
    %c0_5 = arith.constant 0 : index
    %c0_6 = arith.constant 0 : index
    %c0_7 = arith.constant 0 : index
    %4 = vector.load %arg4[%c0_5, %c0_6, %c0_7] : memref<1x8x256xf32, #tpu.memory_space<vmem>>, vector<1x8x256xf32>
    %5 = vector.shape_cast %4 : vector<1x8x256xf32> to vector<8x256xf32>
    %c0_8 = arith.constant 0 : index
    %c0_9 = arith.constant 0 : index
    %c0_10 = arith.constant 0 : index
    %6 = vector.load %arg5[%c0_8, %c0_9, %c0_10] : memref<1x8x8xf32, #tpu.memory_space<vmem>>, vector<1x8x8xf32>
    %7 = vector.shape_cast %6 : vector<1x8x8xf32> to vector<8x8xf32>
    %c0_11 = arith.constant 0 : index
    %c0_12 = arith.constant 0 : index
    %8 = vector.load %arg6[%c0_11, %c0_12] : memref<32x256xf32, #tpu.memory_space<vmem>>, vector<32x256xf32>
    %cst = arith.constant dense<0.000000e+00> : vector<8x256xf32>
    %9 = tpu.matmul %1, %8, %cst {dimension_numbers = #tpu.dot_dimension_numbers<[1], [0], [0], [1], [0, 0, 1, 1], [], []>} : vector<8x32xf32>, vector<32x256xf32>, vector<8x256xf32> -> vector<8x256xf32>
    %10 = vector.broadcast %3 : vector<1x256xf32> to vector<8x256xf32>
    %11 = arith.addf %9, %10 : vector<8x256xf32>
    %12 = arith.addf %11, %5 : vector<8x256xf32>
    %cst_13 = arith.constant 0.000000e+00 : f32
    %13 = vector.broadcast %cst_13 : f32 to vector<8x256xf32>
    %14 = arith.maximumf %12, %13 : vector<8x256xf32>
    %c0_14 = arith.constant 0 : index
    %c0_15 = arith.constant 0 : index
    %15 = vector.load %arg8[%c0_14, %c0_15] : memref<256x128xf32, #tpu.memory_space<vmem>>, vector<256x128xf32>
    %cst_16 = arith.constant dense<0.000000e+00> : vector<8x128xf32>
    %16 = tpu.matmul %14, %15, %cst_16 {dimension_numbers = #tpu.dot_dimension_numbers<[1], [0], [0], [1], [0, 0, 1, 1], [], []>} : vector<8x256xf32>, vector<256x128xf32>, vector<8x128xf32> -> vector<8x128xf32>
    %cst_17 = arith.constant 0.000000e+00 : f32
    %17 = vector.broadcast %cst_17 : f32 to vector<8x128xf32>
    %18 = arith.maximumf %16, %17 : vector<8x128xf32>
    %c0_18 = arith.constant 0 : index
    %c0_19 = arith.constant 0 : index
    %19 = vector.load %arg7[%c0_18, %c0_19] : memref<8x256xf32, #tpu.memory_space<vmem>>, vector<8x256xf32>
    %cst_20 = arith.constant dense<0.000000e+00> : vector<8x256xf32>
    %20 = tpu.matmul %7, %19, %cst_20 {dimension_numbers = #tpu.dot_dimension_numbers<[1], [0], [0], [1], [0, 0, 1, 1], [], []>} : vector<8x8xf32>, vector<8x256xf32>, vector<8x256xf32> -> vector<8x256xf32>
    %21 = arith.mulf %20, %14 : vector<8x256xf32>
    %c0_21 = arith.constant 0 : index
    %c0_22 = arith.constant 0 : index
    %22 = vector.load %arg9[%c0_21, %c0_22] : memref<256x16xf32, #tpu.memory_space<vmem>>, vector<256x16xf32>
    %cst_23 = arith.constant dense<0.000000e+00> : vector<8x16xf32>
    %23 = tpu.matmul %21, %22, %cst_23 {dimension_numbers = #tpu.dot_dimension_numbers<[1], [0], [0], [1], [0, 0, 1, 1], [], []>} : vector<8x256xf32>, vector<256x16xf32>, vector<8x16xf32> -> vector<8x16xf32>
    %cst_24 = arith.constant 0.000000e+00 : f32
    %24 = vector.broadcast %cst_24 : f32 to vector<8x16xf32>
    %25 = arith.maximumf %23, %24 : vector<8x16xf32>
    %c0_25 = arith.constant 0 : index
    %c0_26 = arith.constant 0 : index
    %c0_27 = arith.constant 0 : index
    %26 = vector.load %arg10[%c0_25, %c0_26, %c0_27] : memref<1x8x16xf32, #tpu.memory_space<vmem>>, vector<1x8x16xf32>
    %27 = vector.shape_cast %26 : vector<1x8x16xf32> to vector<8x16xf32>
    %28 = vector.shape_cast %25 : vector<8x16xf32> to vector<1x8x16xf32>
    tpu.vector_store %arg10[%c0_25, %c0_26, %c0_27], %28 {strides = array<i32>} : memref<1x8x16xf32, #tpu.memory_space<vmem>>, vector<1x8x16xf32>,
    %29 = arith.truncf %18 : vector<8x128xf32> to vector<8x128xbf16>
    %c0_28 = arith.constant 0 : index
    %c0_29 = arith.constant 0 : index
    %c0_30 = arith.constant 0 : index
    %30 = vector.load %arg11[%c0_28, %c0_29, %c0_30] : memref<1x8x128xbf16, #tpu.memory_space<vmem>>, vector<1x8x128xbf16>
    %31 = vector.shape_cast %30 : vector<1x8x128xbf16> to vector<8x128xbf16>
    %32 = vector.shape_cast %29 : vector<8x128xbf16> to vector<1x8x128xbf16>
    tpu.vector_store %arg11[%c0_28, %c0_29, %c0_30], %32 {strides = array<i32>} : memref<1x8x128xbf16, #tpu.memory_space<vmem>>, vector<1x8x128xbf16>,
    return
  }
  func.func @transform_0(%arg0: i32, %arg1: i32) -> (i32, i32, i32) {
    %c0_i32 = arith.constant 0 : i32
    %c0_i32_0 = arith.constant 0 : i32
    return %arg0, %arg1, %c0_i32 : i32, i32, i32
  }
  func.func @transform_1(%arg0: i32, %arg1: i32) -> (i32, i32, i32) {
    %c0_i32 = arith.constant 0 : i32
    %c0_i32_0 = arith.constant 0 : i32
    %c0_i32_1 = arith.constant 0 : i32
    return %arg0, %c0_i32, %c0_i32_0 : i32, i32, i32
  }
  func.func @transform_2(%arg0: i32, %arg1: i32) -> (i32, i32, i32) {
    %c0_i32 = arith.constant 0 : i32
    %c0_i32_0 = arith.constant 0 : i32
    return %arg0, %arg1, %c0_i32 : i32, i32, i32
  }
  func.func @transform_3(%arg0: i32, %arg1: i32) -> (i32, i32, i32) {
    %c0_i32 = arith.constant 0 : i32
    %c0_i32_0 = arith.constant 0 : i32
    return %arg0, %arg1, %c0_i32 : i32, i32, i32
  }
  func.func @transform_4(%arg0: i32, %arg1: i32) -> (i32, i32) {
    %c0_i32 = arith.constant 0 : i32
    %c0_i32_0 = arith.constant 0 : i32
    %c0_i32_1 = arith.constant 0 : i32
    return %c0_i32, %c0_i32_0 : i32, i32
  }
  func.func @transform_5(%arg0: i32, %arg1: i32) -> (i32, i32) {
    %c0_i32 = arith.constant 0 : i32
    %c0_i32_0 = arith.constant 0 : i32
    %c0_i32_1 = arith.constant 0 : i32
    return %c0_i32, %c0_i32_0 : i32, i32
  }
  func.func @transform_6(%arg0: i32, %arg1: i32) -> (i32, i32) {
    %c0_i32 = arith.constant 0 : i32
    %c0_i32_0 = arith.constant 0 : i32
    %c0_i32_1 = arith.constant 0 : i32
    return %c0_i32, %c0_i32_0 : i32, i32
  }
  func.func @transform_7(%arg0: i32, %arg1: i32) -> (i32, i32) {
    %c0_i32 = arith.constant 0 : i32
    %c0_i32_0 = arith.constant 0 : i32
    %c0_i32_1 = arith.constant 0 : i32
    return %c0_i32, %c0_i32_0 : i32, i32
  }
  func.func @transform_8(%arg0: i32, %arg1: i32) -> (i32, i32, i32) {
    %c0_i32 = arith.constant 0 : i32
    %c0_i32_0 = arith.constant 0 : i32
    return %arg0, %arg1, %c0_i32 : i32, i32, i32
  }
  func.func @transform_9(%arg0: i32, %arg1: i32) -> (i32, i32, i32) {
    %c0_i32 = arith.constant 0 : i32
    %c0_i32_0 = arith.constant 0 : i32
    return %arg0, %arg1, %c0_i32 : i32, i32, i32
  }
}

module attributes {stable_mosaic.version = 11 : i64} {
  func.func @gcn_kernel(%arg0: i32, %arg1: i32, %arg2: memref<1x8x32xf32, #tpu.memory_space<vmem>>, %arg3: memref<1x1x256xf32, #tpu.memory_space<vmem>>, %arg4: memref<1x8x256xf32, #tpu.memory_space<vmem>>, %arg5: memref<1x8x8xf32, #tpu.memory_space<vmem>>, %arg6: memref<32x256xf32, #tpu.memory_space<vmem>>, %arg7: memref<8x256xf32, #tpu.memory_space<vmem>>, %arg8: memref<256x128xf32, #tpu.memory_space<vmem>>, %arg9: memref<256x16xf32, #tpu.memory_space<vmem>>, %arg10: memref<1x8x16xf32, #tpu.memory_space<vmem>>, %arg11: memref<1x8x128xbf16, #tpu.memory_space<vmem>>) attributes {dimension_semantics = [#tpu.dimension_semantics<parallel>, #tpu.dimension_semantics<parallel>], iteration_bounds = array<i64: 2, 1>, scalar_prefetch = 0 : i64, scratch_operands = 0 : i64, tpu.core_type = #tpu.core_type<tc>, window_params = [{transform_indices = @transform_0, window_bounds = array<i64: 1, 8, 32>}, {transform_indices = @transform_1, window_bounds = array<i64: 1, 1, 256>}, {transform_indices = @transform_2, window_bounds = array<i64: 1, 8, 256>}, {transform_indices = @transform_3, window_bounds = array<i64: 1, 8, 8>}, {pipeline_mode = #tpu.pipeline_mode<synchronous>, transform_indices = @transform_4, window_bounds = array<i64: 32, 256>}, {pipeline_mode = #tpu.pipeline_mode<synchronous>, transform_indices = @transform_5, window_bounds = array<i64: 8, 256>}, {pipeline_mode = #tpu.pipeline_mode<synchronous>, transform_indices = @transform_6, window_bounds = array<i64: 256, 128>}, {pipeline_mode = #tpu.pipeline_mode<synchronous>, transform_indices = @transform_7, window_bounds = array<i64: 256, 16>}, {transform_indices = @transform_8, window_bounds = array<i64: 1, 8, 16>}, {transform_indices = @transform_9, window_bounds = array<i64: 1, 8, 128>}]} {
    %c0 = arith.constant 0 : index
    %c0_0 = arith.constant 0 : index
    %c0_1 = arith.constant 0 : index
    %0 = vector.load %arg2[%c0, %c0_0, %c0_1] : memref<1x8x32xf32, #tpu.memory_space<vmem>>, vector<1x8x32xf32>
    %1 = vector.shape_cast %0 : vector<1x8x32xf32> to vector<8x32xf32>
    %c0_2 = arith.constant 0 : index
    %c0_3 = arith.constant 0 : index
    %c0_4 = arith.constant 0 : index
    %2 = vector.load %arg3[%c0_2, %c0_3, %c0_4] : memref<1x1x256xf32, #tpu.memory_space<vmem>>, vector<1x1x256xf32>
    %3 = vector.shape_cast %2 : vector<1x1x256xf32> to vector<1x256xf32>
    %c0_5 = arith.constant 0 : index
    %c0_6 = arith.constant 0 : index
    %c0_7 = arith.constant 0 : index
    %4 = vector.load %arg4[%c0_5, %c0_6, %c0_7] : memref<1x8x256xf32, #tpu.memory_space<vmem>>, vector<1x8x256xf32>
    %5 = vector.shape_cast %4 : vector<1x8x256xf32> to vector<8x256xf32>
    %c0_8 = arith.constant 0 : index
    %c0_9 = arith.constant 0 : index
    %c0_10 = arith.constant 0 : index
    %6 = vector.load %arg5[%c0_8, %c0_9, %c0_10] : memref<1x8x8xf32, #tpu.memory_space<vmem>>, vector<1x8x8xf32>
    %7 = vector.shape_cast %6 : vector<1x8x8xf32> to vector<8x8xf32>
    %c0_11 = arith.constant 0 : index
    %c0_12 = arith.constant 0 : index
    %8 = vector.load %arg6[%c0_11, %c0_12] : memref<32x256xf32, #tpu.memory_space<vmem>>, vector<32x256xf32>
    %cst = arith.constant dense<0.000000e+00> : vector<8x256xf32>
    %9 = tpu.matmul %1, %8, %cst {dimension_numbers = #tpu.dot_dimension_numbers<[1], [0], [0], [1], [0, 0, 1, 1], [], []>} : vector<8x32xf32>, vector<32x256xf32>, vector<8x256xf32> -> vector<8x256xf32>
    %10 = vector.broadcast %3 : vector<1x256xf32> to vector<8x256xf32>
    %11 = arith.addf %9, %10 : vector<8x256xf32>
    %12 = arith.addf %11, %5 : vector<8x256xf32>
    %cst_13 = arith.constant 0.000000e+00 : f32
    %13 = vector.broadcast %cst_13 : f32 to vector<8x256xf32>
    %14 = arith.maximumf %12, %13 : vector<8x256xf32>
    %c0_14 = arith.constant 0 : index
    %c0_15 = arith.constant 0 : index
    %15 = vector.load %arg8[%c0_14, %c0_15] : memref<256x128xf32, #tpu.memory_space<vmem>>, vector<256x128xf32>
    %cst_16 = arith.constant dense<0.000000e+00> : vector<8x128xf32>
    %16 = tpu.matmul %14, %15, %cst_16 {dimension_numbers = #tpu.dot_dimension_numbers<[1], [0], [0], [1], [0, 0, 1, 1], [], []>} : vector<8x256xf32>, vector<256x128xf32>, vector<8x128xf32> -> vector<8x128xf32>
    %cst_17 = arith.constant 0.000000e+00 : f32
    %17 = vector.broadcast %cst_17 : f32 to vector<8x128xf32>
    %18 = arith.maximumf %16, %17 : vector<8x128xf32>
    %c0_18 = arith.constant 0 : index
    %c0_19 = arith.constant 0 : index
    %19 = vector.load %arg7[%c0_18, %c0_19] : memref<8x256xf32, #tpu.memory_space<vmem>>, vector<8x256xf32>
    %cst_20 = arith.constant dense<0.000000e+00> : vector<8x256xf32>
    %20 = tpu.matmul %7, %19, %cst_20 {dimension_numbers = #tpu.dot_dimension_numbers<[1], [0], [0], [1], [0, 0, 1, 1], [], []>} : vector<8x8xf32>, vector<8x256xf32>, vector<8x256xf32> -> vector<8x256xf32>
    %21 = arith.mulf %20, %14 : vector<8x256xf32>
    %c0_21 = arith.constant 0 : index
    %c0_22 = arith.constant 0 : index
    %22 = vector.load %arg9[%c0_21, %c0_22] : memref<256x16xf32, #tpu.memory_space<vmem>>, vector<256x16xf32>
    %cst_23 = arith.constant dense<0.000000e+00> : vector<8x16xf32>
    %23 = tpu.matmul %21, %22, %cst_23 {dimension_numbers = #tpu.dot_dimension_numbers<[1], [0], [0], [1], [0, 0, 1, 1], [], []>} : vector<8x256xf32>, vector<256x16xf32>, vector<8x16xf32> -> vector<8x16xf32>
    %cst_24 = arith.constant 0.000000e+00 : f32
    %24 = vector.broadcast %cst_24 : f32 to vector<8x16xf32>
    %25 = arith.maximumf %23, %24 : vector<8x16xf32>
    %c0_25 = arith.constant 0 : index
    %c0_26 = arith.constant 0 : index
    %c0_27 = arith.constant 0 : index
    %26 = vector.load %arg10[%c0_25, %c0_26, %c0_27] : memref<1x8x16xf32, #tpu.memory_space<vmem>>, vector<1x8x16xf32>
    %27 = vector.shape_cast %26 : vector<1x8x16xf32> to vector<8x16xf32>
    %28 = vector.shape_cast %25 : vector<8x16xf32> to vector<1x8x16xf32>
    tpu.vector_store %arg10[%c0_25, %c0_26, %c0_27], %28 {strides = array<i32>} : memref<1x8x16xf32, #tpu.memory_space<vmem>>, vector<1x8x16xf32>,
    %29 = arith.truncf %18 : vector<8x128xf32> to vector<8x128xbf16>
    %c0_28 = arith.constant 0 : index
    %c0_29 = arith.constant 0 : index
    %c0_30 = arith.constant 0 : index
    %30 = vector.load %arg11[%c0_28, %c0_29, %c0_30] : memref<1x8x128xbf16, #tpu.memory_space<vmem>>, vector<1x8x128xbf16>
    %31 = vector.shape_cast %30 : vector<1x8x128xbf16> to vector<8x128xbf16>
    %32 = vector.shape_cast %29 : vector<8x128xbf16> to vector<1x8x128xbf16>
    tpu.vector_store %arg11[%c0_28, %c0_29, %c0_30], %32 {strides = array<i32>} : memref<1x8x128xbf16, #tpu.memory_space<vmem>>, vector<1x8x128xbf16>,
    return
  }
  func.func @transform_0(%arg0: i32, %arg1: i32) -> (i32, i32, i32) {
    %c0_i32 = arith.constant 0 : i32
    %c0_i32_0 = arith.constant 0 : i32
    return %arg0, %arg1, %c0_i32 : i32, i32, i32
  }
  func.func @transform_1(%arg0: i32, %arg1: i32) -> (i32, i32, i32) {
    %c0_i32 = arith.constant 0 : i32
    %c0_i32_0 = arith.constant 0 : i32
    %c0_i32_1 = arith.constant 0 : i32
    return %arg0, %c0_i32, %c0_i32_0 : i32, i32, i32
  }
  func.func @transform_2(%arg0: i32, %arg1: i32) -> (i32, i32, i32) {
    %c0_i32 = arith.constant 0 : i32
    %c0_i32_0 = arith.constant 0 : i32
    return %arg0, %arg1, %c0_i32 : i32, i32, i32
  }
  func.func @transform_3(%arg0: i32, %arg1: i32) -> (i32, i32, i32) {
    %c0_i32 = arith.constant 0 : i32
    %c0_i32_0 = arith.constant 0 : i32
    return %arg0, %arg1, %c0_i32 : i32, i32, i32
  }
  func.func @transform_4(%arg0: i32, %arg1: i32) -> (i32, i32) {
    %c0_i32 = arith.constant 0 : i32
    %c0_i32_0 = arith.constant 0 : i32
    %c0_i32_1 = arith.constant 0 : i32
    return %c0_i32, %c0_i32_0 : i32, i32
  }
  func.func @transform_5(%arg0: i32, %arg1: i32) -> (i32, i32) {
    %c0_i32 = arith.constant 0 : i32
    %c0_i32_0 = arith.constant 0 : i32
    %c0_i32_1 = arith.constant 0 : i32
    return %c0_i32, %c0_i32_0 : i32, i32
  }
  func.func @transform_6(%arg0: i32, %arg1: i32) -> (i32, i32) {
    %c0_i32 = arith.constant 0 : i32
    %c0_i32_0 = arith.constant 0 : i32
    %c0_i32_1 = arith.constant 0 : i32
    return %c0_i32, %c0_i32_0 : i32, i32
  }
  func.func @transform_7(%arg0: i32, %arg1: i32) -> (i32, i32) {
    %c0_i32 = arith.constant 0 : i32
    %c0_i32_0 = arith.constant 0 : i32
    %c0_i32_1 = arith.constant 0 : i32
    return %c0_i32, %c0_i32_0 : i32, i32
  }
  func.func @transform_8(%arg0: i32, %arg1: i32) -> (i32, i32, i32) {
    %c0_i32 = arith.constant 0 : i32
    %c0_i32_0 = arith.constant 0 : i32
    return %arg0, %arg1, %c0_i32 : i32, i32, i32
  }
  func.func @transform_9(%arg0: i32, %arg1: i32) -> (i32, i32, i32) {
    %c0_i32 = arith.constant 0 : i32
    %c0_i32_0 = arith.constant 0 : i32
    return %arg0, %arg1, %c0_i32 : i32, i32, i32
  }
}

</mosaic_0001>

<bundles_post_ra>
// kernel: tpu_custom_call.1
= control target key start
LH: loop header
LB: loop body
LE: loop exit
PB: predicated region body
PF: predicated region fallthrough
CT: control target
= control target key end

     0   :  { %s2108_s0 = inlined_call_operand.vmem [shape: f32[2,8,32], index: 0, kind: input, shape index: {}]   ;;  %s2109_s1 = inlined_call_operand.vmem [shape: f32[2,1,256], index: 1, kind: input, shape index: {}]   ;;  %s2110_s2 = inlined_call_operand.vmem [shape: f32[2,8,256], index: 2, kind: input, shape index: {}]   ;;  %s2111_s3 = inlined_call_operand.hbm [shape: f32[2,8,8], index: 3, kind: input, shape index: {}]   ;;  %s2112_s4 = inlined_call_operand.hbm [shape: f32[32,256], index: 4, kind: input, shape index: {}]   ;;  %s2113_s5 = inlined_call_operand.hbm [shape: f32[8,256], index: 5, kind: input, shape index: {}]   ;;  %s2114_s6 = inlined_call_operand.vmem [shape: f32[256,128], index: 6, kind: input, shape index: {}]   ;;  %s2115_s7 = inlined_call_operand.vmem [shape: f32[256,16], index: 7, kind: input, shape index: {}]   ;;  %s2116_s8 = inlined_call_operand.hbm [shape: f32[2,8,16], index: 8, kind: output, shape index: {0}]   ;;  %s2117_s9 = inlined_call_operand.hbm [shape: bf16[2,8,128], index: 9, kind: output, shape index: {1}]  }
   0x1   :  { %2126 = sst [smem:[#allocation17_spill]] %s2108_s0 }
   0x2   :  { %2127 = sst [smem:[#allocation18_spill]] %s2116_s8 }
   0x3   :  { %2128 = sst [smem:[#allocation19_spill]] %s2117_s9 }
   0x4   :  { %15 = vsyncpa [#allocation3], 0 }
   0x5   :  { %17 = vsyncpa [#allocation3 + $0x1], 0 }
   0x6   :  { %18 = vsyncpa [#allocation6], 0 }
   0x7   :  { %19 = vsyncpa [#allocation4], 0 }
   0x8   :  { %21 = vsyncpa [#allocation4 + $0x1], 0 }
   0x9   :  { %22 = vsyncpa [#allocation10], 0 }
   0xa   :  { %24 = vsyncpa [#allocation10 + $0x1], 0  ;;  %s1614_s30 = smov 0   ;;  %s1616_s10 = smov 0  }
   0xb   :  { %s1618_s11 = smov 0   ;;  %s1620_s12 = smov 0  }
   0xc   :  { %s1622_s13 = smov 0   ;;  %s1624_s14 = smov 0  }
   0xd LB: > { %2129 = sst [smem:[#allocation15_spill]] %s1534_s30  ;;  %s1090_s15 = sadd.s32 4294967295, %s1554_s14   ;;  %s1554_s14 = sphi %s1624_s14, %s30_s14   ;;  %s1550_s13 = sphi %s1622_s13, %s2154_s13   ;;  %s1546_s12 = sphi %s1620_s12, %s2153_s12   ;;  %s1542_s11 = sphi %s1618_s11, %s2152_s11   ;;  %s1538_s10 = sphi %s1616_s10, %s2151_s10   ;;  %s1534_s30 = sphi %s1614_s30, %s2150_s30  }
   0xe   : > { %s1091_s16 = sadd.s32 4294967294, %s1554_s14   ;;  %p146_p0 = scmp.ne.s32.totalorder %s1538_s10, %s1534_s30 }
   0xf   : > { %p1648_p1 = scmp.eq.s32.totalorder %s1090_s15, 0  ;;  %p1652_p2 = scmp.eq.s32.totalorder %s1090_s15, 1 }
  0x10   : > { %p262_p3 = scmp.eq.s32.totalorder %s1091_s16, 1  ;;  %p1092_p5 = scmp.ge.s32.totalorder %s1554_s14, 1 }
  0x11   : > { %s2130_s17 = scalar_select %p1648_p1, 1, 0 }
  0x12   : > { %p1658_p4 = por %p1648_p1, %p146_p0  ;;  %p1663_p6 = por %p262_p3, %p146_p0 }
  0x13   : > { %p297_p7 = scmp.lt.s32.totalorder %s1554_s14, 3  ;;  %s1556_s22 = smov [#allocation5]  }
  0x14   : > { %s2132_s19 = scalar_select %p1658_p4, 1, 0 }
  0x15   : > { %s2133_s20 = scalar_select %p1663_p6, 1, 0 }
  0x16   : > { %p1668_p8 = pnand %p1092_p5, %p297_p7  ;;  %s309_s23 = sshll.u32 %s1556_s22, 4  ;;  %s1672_s23 = int_to_ptr.vmem [resolvable:$true] %s309_s23 }
  0x17   : > { %2134 = sst [smem:[#allocation16_spill]] %s2133_s20  ;;  %s1557_s25 = smov [#allocation7]  }
  0x18   : > { %p1273_p9 = pneg %p1668_p8  ;;  %s323_s26 = sshll.u32 %s1557_s25, 4  ;;  %s1683_s26 = int_to_ptr.vmem [resolvable:$true] %s323_s26 }
  0x19   : > { %s1350_s29 = scalar_lea.hbm %s2112_s4, 1024 }
  0x1a   : > { %p1679_p11 = pnand %p1273_p9, %p1648_p1  ;;  %p1351_p12 = scmp.ne.s32.totalorder %s2112_s4, %s1350_s29 }
  0x1b   : > { %p1357_p5 = scmp.lt.u32.totalorder %s1350_s29, %s2112_s4 }
  0x1c   : > { %p1352_p13 = pneg %p1679_p11 }
  0x1e   : > { %p1353_p0 = pnand %p1352_p13, %p1351_p12 }
  0x20   : > { %p1354_p3 = pneg %p1353_p0 }
  0x22   : > { %p1359_p7 = pnand %p1357_p5, %p1354_p3 }
  0x24   : > { %1362 = shalt.err (!%p1359_p7)
}
  0x25   : > { %s1363_s25 = scalar_lea.vmem %s1672_s23, 1024  ;;  %p1371_p1 = scmp.lt.s32.totalorder %s1672_s23, %s1672_s23 }
  0x26   : > { %p1364_p9 = scmp.ne.s32.totalorder %s1672_s23, %s1363_s25  ;;  %p1372_p12 = scmp.lt.s32.totalorder %s1363_s25, %s1363_s25 }
  0x28   : > { %p1366_p10 = pnand %p1364_p9, %p1352_p13  ;;  %p1373_p0 = por %p1372_p12, %p1371_p1 }
  0x2a   : > { %p1367_p6 = pneg %p1366_p10 }
  0x2c   : > { %p1374_p4 = pnand %p1373_p0, %p1367_p6 }
  0x2e   : > { %1377 = shalt.err (!%p1374_p4)
}
  0x2f   : > { %s1558_s20 = smov 256   ;;  %s1559_s27 = smov 16  }
  0x30   : > { %1276 = dma.hbm_to_vmem [thread:$0]  (!%p1679_p11), %s2112_s4, 1024, %s1672_s23, [#allocation6], %s1558_s20, %s1558_s20, %s1559_s27  }
  0x31   : > { %s1378_s22 = scalar_lea.hbm %s2113_s5, 256 }
  0x32   : > { %p1379_p1 = scmp.ne.s32.totalorder %s2113_s5, %s1378_s22  ;;  %p1385_p10 = scmp.lt.u32.totalorder %s1378_s22, %s2113_s5 }
  0x34   : > { %p1381_p4 = pnand %p1379_p1, %p1352_p13 }
  0x36   : > { %p1382_p6 = pneg %p1381_p4 }
  0x38   : > { %p1387_p3 = pnand %p1385_p10, %p1382_p6 }
  0x3a   : > { %1390 = shalt.err (!%p1387_p3)
}
  0x3b   : > { %s1391_s23 = scalar_lea.vmem %s1683_s26, 256  ;;  %p1399_p12 = scmp.lt.s32.totalorder %s1683_s26, %s1683_s26 }
  0x3c   : > { %p1392_p5 = scmp.ne.s32.totalorder %s1683_s26, %s1391_s23  ;;  %p1400_p0 = scmp.lt.s32.totalorder %s1391_s23, %s1391_s23 }
  0x3e   : > { %p1394_p7 = pnand %p1392_p5, %p1352_p13  ;;  %p1401_p1 = por %p1400_p0, %p1399_p12 }
  0x40   : > { %p1395_p9 = pneg %p1394_p7 }
  0x42   : > { %p1402_p4 = pnand %p1401_p1, %p1395_p9 }
  0x44   : > { %1405 = shalt.err (!%p1402_p4)
}
  0x45   : > { %1279 = dma.hbm_to_vmem [thread:$0]  (!%p1679_p11), %s2113_s5, 256, %s1683_s26, [#allocation6]  }
  0x46   : > { %s42_s30 = sadd.s32 1, %s1550_s13  ;;  %s133_s20 = sadd.s32 1, %s1542_s11 }
  0x47   : > { %p44_p13 = scmp.ge.s32.totalorder %s42_s30, 2  ;;  %p140_p6 = scmp.ne.s32.totalorder %s1542_s11, %s1538_s10 }
  0x48   : > { %p141_p10 = scmp.eq.s32.totalorder %s1554_s14, 0  ;;  %p1293_p3 = scmp.lt.s32.totalorder %s1554_s14, 2 }
  0x49   : > { %s2156_s30 = smov (%p44_p13, %s42_s30), 0  ;;  %p1747_p7 = por %p1652_p2, %p140_p6 }
  0x4a   : > { %p142_p5 = por %p141_p10, %p140_p6  ;;  %s128_s27 = ssub.s32 %s1550_s13, %s2156_s30 }
  0x4b   : > { %s2137_s24 = scalar_select %p1747_p7, 1, 0 }
  0x4c   : > { %s369_s28 = sand.u32 1, %s1542_s11   ;;  %p131_p9 = scmp.eq.s32.totalorder %s128_s27, 0 }
  0x4d   : > { %s1096_s26 = sshll.u32 %s369_s28, 3  ;;  %s1097_s29 = sshll.u32 %s1550_s13, 7 }
  0x4e   : > { %s1756_s15 = scalar_select %p131_p9, %s1542_s11, %s133_s20  }
  0x4f   : > { %s1761_s25 = scalar_lea.hbm %s2111_s3, %s1097_s29  ;;  %s373_s18 = scalar_lea.vmem [#allocation2], %s1096_s26 }
  0x50   : > { %s381_s23 = sshll.u32 %s373_s18, 4  ;;  %p1765_p2 = pnand %p1293_p3, %p142_p5  ;;  %s1769_s23 = int_to_ptr.vmem [resolvable:$true] %s381_s23 }
  0x51   : > { %s370_s9 = scalar_lea.sflag [#allocation3], %s369_s28  ;;  %s1406_s20 = scalar_lea.hbm %s1761_s25, 128 }
  0x52   : > { %p1407_p11 = scmp.ne.s32.totalorder %s1761_s25, %s1406_s20  ;;  %p1408_p12 = pneg %p1765_p2 }
  0x53   : > { %s1411_s29 = scalar_lea.hbm %s2111_s3, 256  ;;  %p1412_p4 = scmp.lt.u32.totalorder %s1761_s25, %s2111_s3 }
  0x54   : > { %p1409_p0 = pnand %p1408_p12, %p1407_p11  ;;  %p1413_p13 = scmp.lt.u32.totalorder %s1411_s29, %s1406_s20 }
  0x55   : > { %p1415_p10 = scmp.lt.u32.totalorder %s1406_s20, %s1761_s25 }
  0x56   : > { %p1410_p1 = pneg %p1409_p0  ;;  %p1414_p6 = por %p1413_p13, %p1412_p4 }
  0x58   : > { %p1416_p3 = por %p1415_p10, %p1414_p6 }
  0x5a   : > { %p1417_p5 = pnand %p1416_p3, %p1410_p1 }
  0x5c   : > { %1420 = shalt.err (!%p1417_p5)
}
  0x5d   : > { %s1421_s28 = scalar_lea.vmem %s1769_s23, 128  ;;  %s1560_s18 = smov [#allocation2]  }
  0x5e   : > { %p1422_p9 = scmp.ne.s32.totalorder %s1769_s23, %s1421_s28  ;;  %s1426_s27 = sshll.u32 %s1560_s18, 4  ;;  %s1427_s27 = int_to_ptr.vmem [resolvable:$false] %s1426_s27 }
  0x5f   : > { %s1428_s26 = scalar_lea.vmem %s1427_s27, 256  ;;  %p1429_p7 = scmp.lt.s32.totalorder %s1769_s23, %s1427_s27 }
  0x60   : > { %p1424_p11 = pnand %p1422_p9, %p1408_p12  ;;  %p1430_p4 = scmp.lt.s32.totalorder %s1428_s26, %s1421_s28 }
  0x62   : > { %p1425_p0 = pneg %p1424_p11  ;;  %p1431_p13 = por %p1430_p4, %p1429_p7 }
  0x64   : > { %p1432_p6 = pnand %p1431_p13, %p1425_p0 }
  0x66   : > { %1435 = shalt.err (!%p1432_p6)
}
  0x67   : > { %1283 = dma.hbm_to_vmem [thread:$0]  (!%p1765_p2), %s1761_s25, 128, %s1769_s23, %s370_s9  }
  0x68   : > { %390 = sbr.rel (%p1668_p8) target bundleno = 602 (0x25a), region = 52  ;;  %s1799_s20 = sand.u32 (!%p1668_p8), 1, %s1538_s10  }
  0x69   : > { %s1099_s29 = sshll.u32 (!%p1668_p8), %s1799_s20, 3  ;;  %s393_s16 = scalar_lea.sflag (!%p1668_p8), [#allocation3], %s1799_s20 }
  0x6a   : > { %s396_s22 = scalar_lea.vmem (!%p1668_p8), [#allocation2], %s1099_s29  ;;  %p2139_p7 = scmp.ne.s32.totalorder (!%p1668_p8), %s2132_s19, 0 }
  0x6f   : > { %1517 = dma.done.wait (%p2139_p7), %s393_s16, 128  }
  0x70   : > { %1519 = vsyncadd (%p2139_p7), %s393_s16, 4294967168  ;;  %p2140_p2 = scmp.ne.s32.totalorder %s2130_s17, 0 }
  0x72   : > { %1521 = dma.done.wait (%p2140_p2), [#allocation6], 1280  }
  0x73   : > { %1523 = vsyncadd (%p2140_p2), [#allocation6], 4294966016  ;;  %p464_p8 = scmp.lt.s32.totalorder %s1546_s12, 1  ;;  %v1561_v0 = vmov 0.0   ;;  %v490_v1 = vld [vmem:[#allocation5 + $0x8] sm:$0xff]  ;;  %v492_v2 = vld [vmem:[#allocation5 + $0x18] sm:$0xff] }
  0x74   : > { %576 = vmatprep.mubr.f32.mxu1 %v1561_v0  ;;  %760 = vmatprep.mubr.f32.mxu0 %v1561_v0  ;;  %v489_v3 = vld [vmem:[#allocation5] sm:$0xff]  ;;  %v1187_v4 = vpack.c.bf16 %v492_v2, %v490_v1  ;;  %v491_v5 = vld [vmem:[#allocation5 + $0x10] sm:$0xff]  ;;  %v494_v6 = vld [vmem:[#allocation5 + $0x28] sm:$0xff]  ;;  %vm692_vm0 = vcmask 64512   ;;  %s2141_s0 = sld [smem:[#allocation17_spill]]  ;;  %vm508_vm1 = vcmask 261120  }
  0x75   : > { %s1815_s21 = scalar_select %p464_p8, %s1546_s12, 1  ;;  %v496_v7 = vld [vmem:[#allocation5 + $0x38] sm:$0xff]  ;;  %v1189_v8 = vpack.c.bf16 %v491_v5, %v489_v3  ;;  %v493_v10 = vld [vmem:[#allocation5 + $0x20] sm:$0xff]  ;;  %v495_v11 = vld [vmem:[#allocation5 + $0x30] sm:$0xff]  ;;  %vm872_vm2 = vcmask 130048  }
  0x76   : > { %v1191_v9 = vpack.c.bf16 %v496_v7, %v494_v6  ;;  %1188 = vmatprep.subr.bf16.mxu1 %v1187_v4  ;;  %v691_v12 = vld [vmem:[#allocation7 + $0x8] sm:$0xff]  ;;  %v690_v13 = vld [vmem:[#allocation7] sm:$0xff]  ;;  %v488_v14 = vld [vmem:[%s396_s22] sm:$0xff]  ;;  %v1193_v15 = vpack.c.bf16 %v495_v11, %v493_v10  ;;  %s1112_s26 = sshll.u32 %s1546_s12, 7  ;;  %s456_s16 = scalar_lea.vmem [#allocation8], %s1099_s29 }
  0x77   : > { %s1104_s19 = sshll.u32 %s1815_s21, 3  ;;  %1190 = vmatpush1.bf16.msra.mxu1 %v1189_v8  ;;  %696 = vmatprep.subr.mxu0 %v691_v12  ;;  %v603_v16 = vld [vmem:[%s2114_s6 + $0x80] sm:$0xff]  ;;  %v604_v17 = vld [vmem:[%s2114_s6 + $0x88] sm:$0xff]  ;;  %v605_v26 = vld [vmem:[%s2114_s6 + $0x90] sm:$0xff]  ;;  %s1105_s17 = sshll.u32 %s1815_s21, 1 }
  0x78   : > { %v587_v18 = vld [vmem:[%s2114_s6] sm:$0xff]  ;;  %1192 = vmatprep.subr.bf16.mxu1 %v1191_v9  ;;  %697 = vmatpush1.msra.mxu0 %v690_v13  ;;  %v1195_v19 = vpack.c.bf16 %v604_v17, %v603_v16  ;;  %v588_v20 = vld [vmem:[%s2114_s6 + $0x8] sm:$0xff]  ;;  %v606_v29 = vld [vmem:[%s2114_s6 + $0x98] sm:$0xff]  ;;  %s474_s9 = scalar_lea.vmem %s2109_s1, %s1105_s17  ;;  %s1116_s28 = sshll.u32 %s1815_s21, 4 }
  0x79   : > { %v785_v21 = vld [vmem:[%s2115_s7 + $0x80] sm:$0xff]  ;;  %v786_v22 = vld [vmem:[%s2115_s7 + $0x88] sm:$0xff]  ;;  %1109 = vmatmul.mubr.msk.f32.vlgmr.msra.gmra.mrb[0].mxu0 %vm692_vm0, %v488_v14  ;;  %v1197_v30 = vpack.c.bf16 %v588_v20, %v587_v18  ;;  %v787_v31 = vld [vmem:[%s2115_s7 + $0x90] sm:$0xff]  ;;  %v1199_v34 = vpack.c.bf16 %v606_v29, %v605_v26  ;;  %s483_s27 = scalar_lea.vmem %s2110_s2, %s1116_s28  ;;  %s1103_s21 = sshll.u32 %s1799_s20, 2 }
  0x7a   : > { %s470_s23 = scalar_lea.vmem %s2141_s0, %s1104_s19  ;;  %v1227_v23 = vpack.c.bf16 %v786_v22, %v785_v21  ;;  %v769_v24 = vld [vmem:[%s2115_s7] sm:$0xff]  ;;  %v770_v25 = vld [vmem:[%s2115_s7 + $0x8] sm:$0xff]  ;;  %v788_v32 = vld [vmem:[%s2115_s7 + $0x98] sm:$0xff]  ;;  %s896_s22 = sshll.u32 %s456_s16, 4  ;;  %s2032_s22 = int_to_ptr.vmem [resolvable:$true] %s896_s22 }
  0x7b   : > { %v484_v27 = vld [vmem:[%s470_s23] sm:$0xff]  ;;  %v1229_v28 = vpack.c.bf16 %v770_v25, %v769_v24  ;;  %1194 = vmatpush1.bf16.msra.mxu1 %v1193_v15  ;;  %v771_v33 = vld [vmem:[%s2115_s7 + $0x10] sm:$0xff]  ;;  %v590_v36 = vld [vmem:[%s2114_s6 + $0x18] sm:$0xff]  ;;  %v1231_v37 = vpack.c.bf16 %v788_v32, %v787_v31  ;;  %s1113_s19 = sshll.u32 %s1546_s12, 6  ;;  %s463_s17 = scalar_lea.vmem [#allocation9], %s1103_s21 }
  0x7c   : > { %1228 = vmatprep.subr.bf16.mxu0 %v1227_v23  ;;  %1196 = vmatprep.subr.bf16.mxu1 %v1195_v19  ;;  %v589_v35 = vld [vmem:[%s2114_s6 + $0x10] sm:$0xff]  ;;  %v772_v38 = vld [vmem:[%s2115_s7 + $0x18] sm:$0xff]  ;;  %v607_v40 = vld [vmem:[%s2114_s6 + $0xa0] sm:$0xff]  ;;  %s910_s25 = sshll.u32 %s463_s17, 4  ;;  %s2142_s28 = sld [smem:[#allocation18_spill]]  ;;  %s2039_s25 = int_to_ptr.vmem [resolvable:$true] %s910_s25 }
  0x7d   : > { %1230 = vmatpush3.bf16.msra.mxu0 %v1229_v28  ;;  %v1233_v39 = vpack.c.bf16 %v772_v38, %v771_v33  ;;  %v608_v41 = vld [vmem:[%s2114_s6 + $0xa8] sm:$0xff]  ;;  %v789_v42 = vld [vmem:[%s2115_s7 + $0xa0] sm:$0xff]  ;;  %v1201_v46 = vpack.c.bf16 %v590_v36, %v589_v35  ;;  %v609_v52 = vld [vmem:[%s2114_s6 + $0xb0] sm:$0xff]  ;;  %s877_s12 = scalar_lea.sflag [#allocation4], %s1799_s20  ;;  %s1436_s21 = scalar_lea.vmem %s2032_s22, 128 }
  0x7e   : > { %1108 = vmatmul.mubr.msk.f32.vlgmr.msra.gmra.mrb[0].mxu1 %vm508_vm1, %v484_v27  ;;  %1232 = vmatprep.subr.bf16.mxu0 %v1231_v37  ;;  %v790_v43 = vld [vmem:[%s2115_s7 + $0xa8] sm:$0xff]  ;;  %v773_v44 = vld [vmem:[%s2115_s7 + $0x20] sm:$0xff]  ;;  %v1203_v50 = vpack.c.bf16 %v608_v41, %v607_v40  ;;  %v791_v53 = vld [vmem:[%s2115_s7 + $0xb0] sm:$0xff]  ;;  %p1437_p12 = scmp.ne.s32.totalorder %s2032_s22, %s1436_s21  ;;  %p2144_p1 = scmp.ne.s32.totalorder %s2137_s24, 0 }
  0x7f   : > { %v774_v45 = vld [vmem:[%s2115_s7 + $0x28] sm:$0xff]  ;;  %1198 = vmatpush3.bf16.msra.mxu1 %v1197_v30  ;;  %v591_v47 = vld [vmem:[%s2114_s6 + $0x20] sm:$0xff]  ;;  %v1235_v49 = vpack.c.bf16 %v790_v43, %v789_v42  ;;  %v792_v54 = vld [vmem:[%s2115_s7 + $0xb8] sm:$0xff] }
  0x80   : > { %v592_v48 = vld [vmem:[%s2114_s6 + $0x28] sm:$0xff]  ;;  %1200 = vmatprep.subr.bf16.mxu1 %v1199_v34  ;;  %v1237_v51 = vpack.c.bf16 %v774_v45, %v773_v44  ;;  %v610_v55 = vld [vmem:[%s2114_s6 + $0xb8] sm:$0xff]  ;;  %v1239_v56 = vpack.c.bf16 %v792_v54, %v791_v53  ;;  %v775_v57 = vld [vmem:[%s2115_s7 + $0x30] sm:$0xff]  ;;  %p1438_p10 = pnand %p1437_p12, %p2144_p1 }
  0x81   : > { %1234 = vmatpush3.bf16.msra.mxu0 %v1233_v39  ;;  %v776_v58 = vld [vmem:[%s2115_s7 + $0x38] sm:$0xff]  ;;  %v1205_v59 = vpack.c.bf16 %v592_v48, %v591_v47  ;;  %v793_v60 = vld [vmem:[%s2115_s7 + $0xc0] sm:$0xff]  ;;  %v794_v61 = vld [vmem:[%s2115_s7 + $0xc8] sm:$0xff]  ;;  %v1207_v62 = vpack.c.bf16 %v610_v55, %v609_v52 }
  0x82   : > { %1236 = vmatprep.subr.bf16.mxu0 %v1235_v49  ;;  %v593_v63 = vld [vmem:[%s2114_s6 + $0x30] sm:$0xff]  ;;  %v594_v0 = vld [vmem:[%s2114_s6 + $0x38] sm:$0xff]  ;;  %v1241_v1 = vpack.c.bf16 %v776_v58, %v775_v57  ;;  %v611_v2 = vld [vmem:[%s2114_s6 + $0xc0] sm:$0xff]  ;;  %v1243_v4 = vpack.c.bf16 %v794_v61, %v793_v60  ;;  %v498_v49 = vlaneseq  ;;  %s2030_s18 = scalar_lea.hbm %s2142_s28, %s1112_s26  ;;  %p1439_p3 = pneg %p1438_p10 }
  0x83   : > { %1202 = vmatpush3.bf16.msra.mxu1 %v1201_v46  ;;  %v612_v3 = vld [vmem:[%s2114_s6 + $0xc8] sm:$0xff]  ;;  %v777_v5 = vld [vmem:[%s2115_s7 + $0x40] sm:$0xff]  ;;  %v795_v7 = vld [vmem:[%s2115_s7 + $0xd0] sm:$0xff]  ;;  %v1209_v9 = vpack.c.bf16 %v594_v0, %v593_v63  ;;  %s1562_s26 = smov [#allocation8]  }
  0x84   : > { %1204 = vmatprep.subr.bf16.mxu1 %v1203_v50  ;;  %v778_v6 = vld [vmem:[%s2115_s7 + $0x48] sm:$0xff]  ;;  %v796_v8 = vld [vmem:[%s2115_s7 + $0xd8] sm:$0xff]  ;;  %v1211_v10 = vpack.c.bf16 %v612_v3, %v611_v2  ;;  %v595_v11 = vld [vmem:[%s2114_s6 + $0x40] sm:$0xff]  ;;  %v499_v50 = vshrl.u32 %v498_v49, 7  ;;  %s1440_s8 = sshll.u32 %s1562_s26, 4  ;;  %s1441_s8 = int_to_ptr.vmem [resolvable:$false] %s1440_s8 }
  0x85   : > { %1238 = vmatpush3.bf16.msra.mxu0 %v1237_v51  ;;  %v596_v12 = vld [vmem:[%s2114_s6 + $0x48] sm:$0xff]  ;;  %v1245_v13 = vpack.c.bf16 %v778_v6, %v777_v5  ;;  %v613_v14 = vld [vmem:[%s2114_s6 + $0xd0] sm:$0xff]  ;;  %v614_v15 = vld [vmem:[%s2114_s6 + $0xd8] sm:$0xff]  ;;  %v1247_v16 = vpack.c.bf16 %v796_v8, %v795_v7  ;;  %p1443_p5 = scmp.lt.s32.totalorder %s2032_s22, %s1441_s8 }
  0x86   : > { %1240 = vmatprep.subr.bf16.mxu0 %v1239_v56  ;;  %v1213_v17 = vpack.c.bf16 %v596_v12, %v595_v11  ;;  %v1215_v18 = vpack.c.bf16 %v614_v15, %v613_v14  ;;  %v597_v19 = vld [vmem:[%s2114_s6 + $0x50] sm:$0xff]  ;;  %v598_v20 = vld [vmem:[%s2114_s6 + $0x58] sm:$0xff]  ;;  %v615_v25 = vld [vmem:[%s2114_s6 + $0xe0] sm:$0xff]  ;;  %v500_v51 = vsub.s32 0, %v499_v50  ;;  %v504_v53 = vsub.s32 1, %v499_v50 }
  0x87   : > { %1206 = vmatpush3.bf16.msra.mxu1 %v1205_v59  ;;  %v1217_v21 = vpack.c.bf16 %v598_v20, %v597_v19  ;;  %v779_v22 = vld [vmem:[%s2115_s7 + $0x50] sm:$0xff]  ;;  %v780_v23 = vld [vmem:[%s2115_s7 + $0x58] sm:$0xff]  ;;  %v616_v26 = vld [vmem:[%s2114_s6 + $0xe8] sm:$0xff] }
  0x88   : > { %1208 = vmatprep.subr.bf16.mxu1 %v1207_v62  ;;  %v1249_v24 = vpack.c.bf16 %v780_v23, %v779_v22  ;;  %v1219_v27 = vpack.c.bf16 %v616_v26, %v615_v25  ;;  %v599_v28 = vld [vmem:[%s2114_s6 + $0x60] sm:$0xff]  ;;  %v600_v29 = vld [vmem:[%s2114_s6 + $0x68] sm:$0xff]  ;;  %v617_v37 = vld [vmem:[%s2114_s6 + $0xf0] sm:$0xff] }
  0x89   : > { %1242 = vmatpush3.bf16.msra.mxu0 %v1241_v1  ;;  %v1221_v30 = vpack.c.bf16 %v600_v29, %v599_v28  ;;  %v797_v31 = vld [vmem:[%s2115_s7 + $0xe0] sm:$0xff]  ;;  %v798_v32 = vld [vmem:[%s2115_s7 + $0xe8] sm:$0xff]  ;;  %v618_v38 = vld [vmem:[%s2114_s6 + $0xf8] sm:$0xff] }
  0x8a   : > { %1244 = vmatprep.subr.bf16.mxu0 %v1243_v4  ;;  %v1251_v33 = vpack.c.bf16 %v798_v32, %v797_v31  ;;  %v781_v34 = vld [vmem:[%s2115_s7 + $0x60] sm:$0xff]  ;;  %v782_v35 = vld [vmem:[%s2115_s7 + $0x68] sm:$0xff]  ;;  %v1223_v39 = vpack.c.bf16 %v618_v38, %v617_v37  ;;  %v601_v40 = vld [vmem:[%s2114_s6 + $0x70] sm:$0xff] }
  0x8b   : > { %1210 = vmatpush3.bf16.msra.mxu1 %v1209_v9  ;;  %v1253_v36 = vpack.c.bf16 %v782_v35, %v781_v34  ;;  %v602_v41 = vld [vmem:[%s2114_s6 + $0x78] sm:$0xff]  ;;  %v799_v43 = vld [vmem:[%s2115_s7 + $0xf0] sm:$0xff]  ;;  %v485_v52 = vld [vmem:[%s474_s9] sm:$0x3]  ;;  %s1442_s9 = scalar_lea.vmem %s1441_s8, 256 }
  0x8c   : > { %1212 = vmatprep.subr.bf16.mxu1 %v1211_v10  ;;  %v1225_v42 = vpack.c.bf16 %v602_v41, %v601_v40  ;;  %v800_v44 = vld [vmem:[%s2115_s7 + $0xf8] sm:$0xff]  ;;  %v783_v46 = vld [vmem:[%s2115_s7 + $0x70] sm:$0xff]  ;;  %v501_v56 = vrot.slane %v485_v52, %v500_v51  ;;  %v505_v57 = vrot.slane %v485_v52, %v504_v53  ;;  %v486_v58 = vld [vmem:[%s483_s27] sm:$0xff]  ;;  %p1444_p9 = scmp.lt.s32.totalorder %s1442_s9, %s1436_s21 }
  0x8d   : > { %1246 = vmatpush3.bf16.msra.mxu0 %v1245_v13  ;;  %v1255_v45 = vpack.c.bf16 %v800_v44, %v799_v43  ;;  %v784_v47 = vld [vmem:[%s2115_s7 + $0x78] sm:$0xff]  ;;  %v487_v61 = vld [vmem:[%s483_s27 + $0x8] sm:$0xff]  ;;  %s2143_s27 = sld [smem:[#allocation19_spill]] }
  0x8e   : > { %1248 = vmatprep.subr.bf16.mxu0 %v1247_v16  ;;  %v1257_v48 = vpack.c.bf16 %v784_v47, %v783_v46  ;;  %p1445_p11 = por %p1444_p9, %p1443_p5 }
  0x8f   : > { %1214 = vmatpush3.bf16.msra.mxu1 %v1213_v17 }
  0x90   : > { %1216 = vmatprep.subr.bf16.mxu1 %v1215_v18  ;;  %p1446_p0 = pnand %p1445_p11, %p1439_p3 }
  0x91   : > { %1250 = vmatpush3.bf16.msra.mxu0 %v1249_v24 }
  0x92   : > { %1252 = vmatprep.subr.bf16.mxu0 %v1251_v33 }
  0x93   : > { %1218 = vmatpush3.bf16.msra.mxu1 %v1217_v21  ;;  %s2037_s0 = scalar_lea.hbm %s2143_s27, %s1113_s19 }
  0x94   : > { %1220 = vmatprep.subr.bf16.mxu1 %v1219_v27 }
  0x95   : > { %1254 = vmatpush3.bf16.msra.mxu0 %v1253_v36 }
  0x96   : > { %1256 = vmatprep.subr.bf16.mxu0 %v1255_v45 }
  0x97   : > { %1222 = vmatpush3.bf16.msra.mxu1 %v1221_v30 }
  0x98   : > { %1224 = vmatprep.subr.bf16.mxu1 %v1223_v39 }
  0x99   : > { %1258 = vmatpush3.bf16.msra.mxu0 %v1257_v48 }
  0x9b   : > { %1226 = vmatpush3.bf16.msra.mxu1 %v1225_v42 }
 0x14c   : > { %v762_v54 = vpop.f32.mrb[0].mxu0 }
 0x14d   : > { %v764_v55 = vpop.f32.mrb[1].mxu0 }
 0x151   : > { %v578_v59 = vpop.f32.mrb[0].mxu1 }
 0x152   : > { %v579_v60 = vadd.f32 %v578_v59, %v501_v56  ;;  %v580_v62 = vpop.f32.mrb[1].mxu1 }
 0x153   : > { %v581_v63 = vadd.f32 %v580_v62, %v505_v57 }
 0x154   : > { %v583_v0 = vadd.f32 %v579_v60, %v486_v58 }
 0x155   : > { %v584_v1 = vadd.f32 %v581_v63, %v487_v61 }
 0x156   : > { %v585_v2 = vmax.f32 %v583_v0, 0.0 }
 0x157   : > { %v586_v3 = vmax.f32 %v584_v1, 0.0 }
 0x158   : > { %v767_v4 = vmul.f32 %v762_v54, %v585_v2 }
 0x159   : > { %v768_v5 = vmul.f32 %v764_v55, %v586_v3  ;;  %683 = vmatprep.mubr.f32.mxu1 %v586_v3 }
 0x15a   : > { %684 = vmatmul.mubr.f32.vlgmr.msra.gmra.mrb[2].mxu1 %v585_v2 }
 0x15b   : > { %865 = vmatprep.mubr.f32.mxu0 %v768_v5 }
 0x15c   : > { %866 = vmatmul.mubr.f32.vlgmr.msra.gmra.mrb[2].mxu0 %v767_v4 }
 0x22d   : > { %v1149_v6 = vpop.f32.mrb[2].mxu1 }
 0x22e   : > { %v1150_v7 = vpop.f32.mrb[3].mxu1 }
 0x22f   : > { %v1151_v8 = vadd.f32 %v1150_v7, %v1149_v6  ;;  %v1184_v9 = vpop.f32.mrb[2].mxu0 }
 0x230   : > { %v1185_v10 = vpop.f32.mrb[3].mxu0 }
 0x231   : > { %v689_v11 = vmax.f32 %v1151_v8, 0.0  ;;  %v1186_v12 = vadd.f32 %v1185_v10, %v1184_v9 }
 0x233   : > { %v874_v13 = vpack.c.bf16 %v689_v11, %v689_v11  ;;  %v871_v14 = vmax.f32 %v1186_v12, 0.0 }
 0x235   : > { %873 = vst.msk [vmem:[%s456_s16] sm:$0xff] %vm872_vm2, %v871_v14  ;;  %875 = vst [vmem:[%s463_s17] sm:$0xf] %v874_v13 }
 0x236   : > { %1449 = shalt.err (!%p1446_p0)
}
 0x237   : > { %s1450_s16 = scalar_lea.hbm %s2030_s18, 128  ;;  %s1454_s23 = scalar_lea.hbm %s2142_s28, 256 }
 0x238   : > { %p1451_p4 = scmp.ne.s32.totalorder %s2030_s18, %s1450_s16  ;;  %p1455_p7 = scmp.lt.u32.totalorder %s2030_s18, %s2142_s28 }
 0x239   : > { %p1456_p2 = scmp.lt.u32.totalorder %s1454_s23, %s1450_s16  ;;  %p1458_p12 = scmp.lt.u32.totalorder %s1450_s16, %s2030_s18 }
 0x23a   : > { %p1452_p13 = pnand %p1451_p4, %p2144_p1 }
 0x23b   : > { %p1457_p8 = por %p1456_p2, %p1455_p7 }
 0x23c   : > { %p1453_p6 = pneg %p1452_p13 }
 0x23d   : > { %p1459_p10 = por %p1458_p12, %p1457_p8 }
 0x23f   : > { %p1460_p3 = pnand %p1459_p10, %p1453_p6 }
 0x241   : > { %1463 = shalt.err (!%p1460_p3)
}
 0x242   : > { %1269 = dma.vmem_to_hbm [thread:$0]  (%p2144_p1), %s2032_s22, 128, %s2030_s18, %s877_s12  }
 0x243   : > { %s882_s21 = scalar_lea.sflag [#allocation10], %s1799_s20  ;;  %s1464_s8 = scalar_lea.vmem %s2039_s25, 64 }
 0x244   : > { %p1465_p5 = scmp.ne.s32.totalorder %s2039_s25, %s1464_s8  ;;  %s1563_s9 = smov [#allocation9]  }
 0x245   : > { %s1468_s16 = sshll.u32 %s1563_s9, 4  ;;  %s1469_s16 = int_to_ptr.vmem [resolvable:$false] %s1468_s16 }
 0x246   : > { %p1466_p9 = pnand %p1465_p5, %p2144_p1  ;;  %s1470_s19 = scalar_lea.vmem %s1469_s16, 128 }
 0x247   : > { %p1471_p0 = scmp.lt.s32.totalorder %s2039_s25, %s1469_s16  ;;  %p1472_p4 = scmp.lt.s32.totalorder %s1470_s19, %s1464_s8 }
 0x248   : > { %p1467_p11 = pneg %p1466_p9 }
 0x249   : > { %p1473_p13 = por %p1472_p4, %p1471_p0 }
 0x24b   : > { %p1474_p6 = pnand %p1473_p13, %p1467_p11 }
 0x24d   : > { %1477 = shalt.err (!%p1474_p6)
}
 0x24e   : > { %s1478_s20 = scalar_lea.hbm %s2037_s0, 64  ;;  %s1482_s12 = scalar_lea.hbm %s2143_s27, 128 }
 0x24f   : > { %p1479_p7 = scmp.ne.s32.totalorder %s2037_s0, %s1478_s20  ;;  %p1483_p12 = scmp.lt.u32.totalorder %s2037_s0, %s2143_s27 }
 0x250   : > { %p1484_p10 = scmp.lt.u32.totalorder %s1482_s12, %s1478_s20  ;;  %p1486_p5 = scmp.lt.u32.totalorder %s1478_s20, %s2037_s0 }
 0x251   : > { %p1480_p2 = pnand %p1479_p7, %p2144_p1 }
 0x252   : > { %p1485_p3 = por %p1484_p10, %p1483_p12 }
 0x253   : > { %p1481_p8 = pneg %p1480_p2 }
 0x254   : > { %p1487_p9 = por %p1486_p5, %p1485_p3 }
 0x256   : > { %p1488_p11 = pnand %p1487_p9, %p1481_p8 }
 0x258   : > { %1491 = shalt.err (!%p1488_p11)
}
 0x259   : > { %1270 = dma.vmem_to_hbm [thread:$0]  (%p2144_p1), %s2039_s25, 64, %s2037_s0, %s882_s21  }
 0x25a PF: > { %s2145_s29 = sld [smem:[#allocation15_spill]]  ;;  %s2146_s26 = sld [smem:[#allocation16_spill]] }
 0x25b   : > { %p2148_p4 = scmp.ge.s32.totalorder %s1554_s14, 2 }
 0x260   : > { %s922_s8 = sand.u32 1, %s2145_s29   ;;  %p2147_p0 = scmp.ne.s32.totalorder %s2146_s26, 0 }
 0x261   : > { %s923_s9 = scalar_lea.sflag [#allocation4], %s922_s8 }
 0x262   : > { %p1285_p13 = pnand %p2148_p4, %p2147_p0 }
 0x264   : > { %1525 = dma.done.wait (!%p1285_p13), %s923_s9, 128  }
 0x265   : > { %1527 = vsyncadd (!%p1285_p13), %s923_s9, 4294967168  ;;  %s932_s16 = scalar_lea.sflag [#allocation10], %s922_s8 }
 0x266   : > { %1529 = dma.done.wait (!%p1285_p13), %s932_s16, 64  }
 0x267   : > { %1531 = vsyncadd (!%p1285_p13), %s932_s16, 4294967232  ;;  %s30_s14 = sadd.s32 1, %s1554_s14   ;;  %s2149_s0 = smov %s2156_s30 }
 0x268   : > { %p27_p6 = scmp.ge.s32.totalorder %s30_s14, 4   ;;  %s2150_s30 = smov %s1538_s10 }
 0x269   : > { %s2151_s10 = smov %s1542_s11  ;;  %s2152_s11 = smov %s1756_s15 }
 0x26a   : > { %s2153_s12 = smov %s1550_s13  ;;  %s2154_s13 = smov %s2149_s0 }
 0x26b   :  { %29 = sbr.rel (!%p27_p6) target bundleno = 13 (0xd), region = 131 }
 0x272   :  { %937 = vsyncpa [#allocation3], 1 }
 0x273   :  { %939 = vsyncpa [#allocation3 + $0x1], 1 }
 0x274   :  { %940 = vsyncpa [#allocation6], 1 }
 0x275   :  { %941 = vsyncpa [#allocation4], 1 }
 0x276   :  { %943 = vsyncpa [#allocation4 + $0x1], 1 }
 0x277   :  { %944 = vsyncpa [#allocation10], 1 }
 0x278   :  { %946 = vsyncpa [#allocation10 + $0x1], 1 }

// kernel: tpu_custom_call.1
= control target key start
LH: loop header
LB: loop body
LE: loop exit
PB: predicated region body
PF: predicated region fallthrough
CT: control target
= control target key end

     0   :  { %s2108_s0 = inlined_call_operand.vmem [shape: f32[2,8,32], index: 0, kind: input, shape index: {}]   ;;  %s2109_s1 = inlined_call_operand.vmem [shape: f32[2,1,256], index: 1, kind: input, shape index: {}]   ;;  %s2110_s2 = inlined_call_operand.vmem [shape: f32[2,8,256], index: 2, kind: input, shape index: {}]   ;;  %s2111_s3 = inlined_call_operand.hbm [shape: f32[2,8,8], index: 3, kind: input, shape index: {}]   ;;  %s2112_s4 = inlined_call_operand.hbm [shape: f32[32,256], index: 4, kind: input, shape index: {}]   ;;  %s2113_s5 = inlined_call_operand.hbm [shape: f32[8,256], index: 5, kind: input, shape index: {}]   ;;  %s2114_s6 = inlined_call_operand.vmem [shape: f32[256,128], index: 6, kind: input, shape index: {}]   ;;  %s2115_s7 = inlined_call_operand.vmem [shape: f32[256,16], index: 7, kind: input, shape index: {}]   ;;  %s2116_s8 = inlined_call_operand.hbm [shape: f32[2,8,16], index: 8, kind: output, shape index: {0}]   ;;  %s2117_s9 = inlined_call_operand.hbm [shape: bf16[2,8,128], index: 9, kind: output, shape index: {1}]  }
   0x1   :  { %2126 = sst [smem:[#allocation17_spill]] %s2108_s0 }
   0x2   :  { %2127 = sst [smem:[#allocation18_spill]] %s2116_s8 }
   0x3   :  { %2128 = sst [smem:[#allocation19_spill]] %s2117_s9 }
   0x4   :  { %15 = vsyncpa [#allocation3], 0 }
   0x5   :  { %17 = vsyncpa [#allocation3 + $0x1], 0 }
   0x6   :  { %18 = vsyncpa [#allocation6], 0 }
   0x7   :  { %19 = vsyncpa [#allocation4], 0 }
   0x8   :  { %21 = vsyncpa [#allocation4 + $0x1], 0 }
   0x9   :  { %22 = vsyncpa [#allocation10], 0 }
   0xa   :  { %24 = vsyncpa [#allocation10 + $0x1], 0  ;;  %s1614_s30 = smov 0   ;;  %s1616_s10 = smov 0  }
   0xb   :  { %s1618_s11 = smov 0   ;;  %s1620_s12 = smov 0  }
   0xc   :  { %s1622_s13 = smov 0   ;;  %s1624_s14 = smov 0  }
   0xd LB: > { %2129 = sst [smem:[#allocation15_spill]] %s1534_s30  ;;  %s1090_s15 = sadd.s32 4294967295, %s1554_s14   ;;  %s1554_s14 = sphi %s1624_s14, %s30_s14   ;;  %s1550_s13 = sphi %s1622_s13, %s2154_s13   ;;  %s1546_s12 = sphi %s1620_s12, %s2153_s12   ;;  %s1542_s11 = sphi %s1618_s11, %s2152_s11   ;;  %s1538_s10 = sphi %s1616_s10, %s2151_s10   ;;  %s1534_s30 = sphi %s1614_s30, %s2150_s30  }
   0xe   : > { %s1091_s16 = sadd.s32 4294967294, %s1554_s14   ;;  %p146_p0 = scmp.ne.s32.totalorder %s1538_s10, %s1534_s30 }
   0xf   : > { %p1648_p1 = scmp.eq.s32.totalorder %s1090_s15, 0  ;;  %p1652_p2 = scmp.eq.s32.totalorder %s1090_s15, 1 }
  0x10   : > { %p262_p3 = scmp.eq.s32.totalorder %s1091_s16, 1  ;;  %p1092_p5 = scmp.ge.s32.totalorder %s1554_s14, 1 }
  0x11   : > { %s2130_s17 = scalar_select %p1648_p1, 1, 0 }
  0x12   : > { %p1658_p4 = por %p1648_p1, %p146_p0  ;;  %p1663_p6 = por %p262_p3, %p146_p0 }
  0x13   : > { %p297_p7 = scmp.lt.s32.totalorder %s1554_s14, 3  ;;  %s1556_s22 = smov [#allocation5]  }
  0x14   : > { %s2132_s19 = scalar_select %p1658_p4, 1, 0 }
  0x15   : > { %s2133_s20 = scalar_select %p1663_p6, 1, 0 }
  0x16   : > { %p1668_p8 = pnand %p1092_p5, %p297_p7  ;;  %s309_s23 = sshll.u32 %s1556_s22, 4  ;;  %s1672_s23 = int_to_ptr.vmem [resolvable:$true] %s309_s23 }
  0x17   : > { %2134 = sst [smem:[#allocation16_spill]] %s2133_s20  ;;  %s1557_s25 = smov [#allocation7]  }
  0x18   : > { %p1273_p9 = pneg %p1668_p8  ;;  %s323_s26 = sshll.u32 %s1557_s25, 4  ;;  %s1683_s26 = int_to_ptr.vmem [resolvable:$true] %s323_s26 }
  0x19   : > { %s1350_s29 = scalar_lea.hbm %s2112_s4, 1024 }
  0x1a   : > { %p1679_p11 = pnand %p1273_p9, %p1648_p1  ;;  %p1351_p12 = scmp.ne.s32.totalorder %s2112_s4, %s1350_s29 }
  0x1b   : > { %p1357_p5 = scmp.lt.u32.totalorder %s1350_s29, %s2112_s4 }
  0x1c   : > { %p1352_p13 = pneg %p1679_p11 }
  0x1e   : > { %p1353_p0 = pnand %p1352_p13, %p1351_p12 }
  0x20   : > { %p1354_p3 = pneg %p1353_p0 }
  0x22   : > { %p1359_p7 = pnand %p1357_p5, %p1354_p3 }
  0x24   : > { %1362 = shalt.err (!%p1359_p7)
}
  0x25   : > { %s1363_s25 = scalar_lea.vmem %s1672_s23, 1024  ;;  %p1371_p1 = scmp.lt.s32.totalorder %s1672_s23, %s1672_s23 }
  0x26   : > { %p1364_p9 = scmp.ne.s32.totalorder %s1672_s23, %s1363_s25  ;;  %p1372_p12 = scmp.lt.s32.totalorder %s1363_s25, %s1363_s25 }
  0x28   : > { %p1366_p10 = pnand %p1364_p9, %p1352_p13  ;;  %p1373_p0 = por %p1372_p12, %p1371_p1 }
  0x2a   : > { %p1367_p6 = pneg %p1366_p10 }
  0x2c   : > { %p1374_p4 = pnand %p1373_p0, %p1367_p6 }
  0x2e   : > { %1377 = shalt.err (!%p1374_p4)
}
  0x2f   : > { %s1558_s20 = smov 256   ;;  %s1559_s27 = smov 16  }
  0x30   : > { %1276 = dma.hbm_to_vmem [thread:$0]  (!%p1679_p11), %s2112_s4, 1024, %s1672_s23, [#allocation6], %s1558_s20, %s1558_s20, %s1559_s27  }
  0x31   : > { %s1378_s22 = scalar_lea.hbm %s2113_s5, 256 }
  0x32   : > { %p1379_p1 = scmp.ne.s32.totalorder %s2113_s5, %s1378_s22  ;;  %p1385_p10 = scmp.lt.u32.totalorder %s1378_s22, %s2113_s5 }
  0x34   : > { %p1381_p4 = pnand %p1379_p1, %p1352_p13 }
  0x36   : > { %p1382_p6 = pneg %p1381_p4 }
  0x38   : > { %p1387_p3 = pnand %p1385_p10, %p1382_p6 }
  0x3a   : > { %1390 = shalt.err (!%p1387_p3)
}
  0x3b   : > { %s1391_s23 = scalar_lea.vmem %s1683_s26, 256  ;;  %p1399_p12 = scmp.lt.s32.totalorder %s1683_s26, %s1683_s26 }
  0x3c   : > { %p1392_p5 = scmp.ne.s32.totalorder %s1683_s26, %s1391_s23  ;;  %p1400_p0 = scmp.lt.s32.totalorder %s1391_s23, %s1391_s23 }
  0x3e   : > { %p1394_p7 = pnand %p1392_p5, %p1352_p13  ;;  %p1401_p1 = por %p1400_p0, %p1399_p12 }
  0x40   : > { %p1395_p9 = pneg %p1394_p7 }
  0x42   : > { %p1402_p4 = pnand %p1401_p1, %p1395_p9 }
  0x44   : > { %1405 = shalt.err (!%p1402_p4)
}
  0x45   : > { %1279 = dma.hbm_to_vmem [thread:$0]  (!%p1679_p11), %s2113_s5, 256, %s1683_s26, [#allocation6]  }
  0x46   : > { %s42_s30 = sadd.s32 1, %s1550_s13  ;;  %s133_s20 = sadd.s32 1, %s1542_s11 }
  0x47   : > { %p44_p13 = scmp.ge.s32.totalorder %s42_s30, 2  ;;  %p140_p6 = scmp.ne.s32.totalorder %s1542_s11, %s1538_s10 }
  0x48   : > { %p141_p10 = scmp.eq.s32.totalorder %s1554_s14, 0  ;;  %p1293_p3 = scmp.lt.s32.totalorder %s1554_s14, 2 }
  0x49   : > { %s2156_s30 = smov (%p44_p13, %s42_s30), 0  ;;  %p1747_p7 = por %p1652_p2, %p140_p6 }
  0x4a   : > { %p142_p5 = por %p141_p10, %p140_p6  ;;  %s128_s27 = ssub.s32 %s1550_s13, %s2156_s30 }
  0x4b   : > { %s2137_s24 = scalar_select %p1747_p7, 1, 0 }
  0x4c   : > { %s369_s28 = sand.u32 1, %s1542_s11   ;;  %p131_p9 = scmp.eq.s32.totalorder %s128_s27, 0 }
  0x4d   : > { %s1096_s26 = sshll.u32 %s369_s28, 3  ;;  %s1097_s29 = sshll.u32 %s1550_s13, 7 }
  0x4e   : > { %s1756_s15 = scalar_select %p131_p9, %s1542_s11, %s133_s20  }
  0x4f   : > { %s1761_s25 = scalar_lea.hbm %s2111_s3, %s1097_s29  ;;  %s373_s18 = scalar_lea.vmem [#allocation2], %s1096_s26 }
  0x50   : > { %s381_s23 = sshll.u32 %s373_s18, 4  ;;  %p1765_p2 = pnand %p1293_p3, %p142_p5  ;;  %s1769_s23 = int_to_ptr.vmem [resolvable:$true] %s381_s23 }
  0x51   : > { %s370_s9 = scalar_lea.sflag [#allocation3], %s369_s28  ;;  %s1406_s20 = scalar_lea.hbm %s1761_s25, 128 }
  0x52   : > { %p1407_p11 = scmp.ne.s32.totalorder %s1761_s25, %s1406_s20  ;;  %p1408_p12 = pneg %p1765_p2 }
  0x53   : > { %s1411_s29 = scalar_lea.hbm %s2111_s3, 256  ;;  %p1412_p4 = scmp.lt.u32.totalorder %s1761_s25, %s2111_s3 }
  0x54   : > { %p1409_p0 = pnand %p1408_p12, %p1407_p11  ;;  %p1413_p13 = scmp.lt.u32.totalorder %s1411_s29, %s1406_s20 }
  0x55   : > { %p1415_p10 = scmp.lt.u32.totalorder %s1406_s20, %s1761_s25 }
  0x56   : > { %p1410_p1 = pneg %p1409_p0  ;;  %p1414_p6 = por %p1413_p13, %p1412_p4 }
  0x58   : > { %p1416_p3 = por %p1415_p10, %p1414_p6 }
  0x5a   : > { %p1417_p5 = pnand %p1416_p3, %p1410_p1 }
  0x5c   : > { %1420 = shalt.err (!%p1417_p5)
}
  0x5d   : > { %s1421_s28 = scalar_lea.vmem %s1769_s23, 128  ;;  %s1560_s18 = smov [#allocation2]  }
  0x5e   : > { %p1422_p9 = scmp.ne.s32.totalorder %s1769_s23, %s1421_s28  ;;  %s1426_s27 = sshll.u32 %s1560_s18, 4  ;;  %s1427_s27 = int_to_ptr.vmem [resolvable:$false] %s1426_s27 }
  0x5f   : > { %s1428_s26 = scalar_lea.vmem %s1427_s27, 256  ;;  %p1429_p7 = scmp.lt.s32.totalorder %s1769_s23, %s1427_s27 }
  0x60   : > { %p1424_p11 = pnand %p1422_p9, %p1408_p12  ;;  %p1430_p4 = scmp.lt.s32.totalorder %s1428_s26, %s1421_s28 }
  0x62   : > { %p1425_p0 = pneg %p1424_p11  ;;  %p1431_p13 = por %p1430_p4, %p1429_p7 }
  0x64   : > { %p1432_p6 = pnand %p1431_p13, %p1425_p0 }
  0x66   : > { %1435 = shalt.err (!%p1432_p6)
}
  0x67   : > { %1283 = dma.hbm_to_vmem [thread:$0]  (!%p1765_p2), %s1761_s25, 128, %s1769_s23, %s370_s9  }
  0x68   : > { %390 = sbr.rel (%p1668_p8) target bundleno = 602 (0x25a), region = 52  ;;  %s1799_s20 = sand.u32 (!%p1668_p8), 1, %s1538_s10  }
  0x69   : > { %s1099_s29 = sshll.u32 (!%p1668_p8), %s1799_s20, 3  ;;  %s393_s16 = scalar_lea.sflag (!%p1668_p8), [#allocation3], %s1799_s20 }
  0x6a   : > { %s396_s22 = scalar_lea.vmem (!%p1668_p8), [#allocation2], %s1099_s29  ;;  %p2139_p7 = scmp.ne.s32.totalorder (!%p1668_p8), %s2132_s19, 0 }
  0x6f   : > { %1517 = dma.done.wait (%p2139_p7), %s393_s16, 128  }
  0x70   : > { %1519 = vsyncadd (%p2139_p7), %s393_s16, 4294967168  ;;  %p2140_p2 = scmp.ne.s32.totalorder %s2130_s17, 0 }
  0x72   : > { %1521 = dma.done.wait (%p2140_p2), [#allocation6], 1280  }
  0x73   : > { %1523 = vsyncadd (%p2140_p2), [#allocation6], 4294966016  ;;  %p464_p8 = scmp.lt.s32.totalorder %s1546_s12, 1  ;;  %v1561_v0 = vmov 0.0   ;;  %v490_v1 = vld [vmem:[#allocation5 + $0x8] sm:$0xff]  ;;  %v492_v2 = vld [vmem:[#allocation5 + $0x18] sm:$0xff] }
  0x74   : > { %576 = vmatprep.mubr.f32.mxu1 %v1561_v0  ;;  %760 = vmatprep.mubr.f32.mxu0 %v1561_v0  ;;  %v489_v3 = vld [vmem:[#allocation5] sm:$0xff]  ;;  %v1187_v4 = vpack.c.bf16 %v492_v2, %v490_v1  ;;  %v491_v5 = vld [vmem:[#allocation5 + $0x10] sm:$0xff]  ;;  %v494_v6 = vld [vmem:[#allocation5 + $0x28] sm:$0xff]  ;;  %vm692_vm0 = vcmask 64512   ;;  %s2141_s0 = sld [smem:[#allocation17_spill]]  ;;  %vm508_vm1 = vcmask 261120  }
  0x75   : > { %s1815_s21 = scalar_select %p464_p8, %s1546_s12, 1  ;;  %v496_v7 = vld [vmem:[#allocation5 + $0x38] sm:$0xff]  ;;  %v1189_v8 = vpack.c.bf16 %v491_v5, %v489_v3  ;;  %v493_v10 = vld [vmem:[#allocation5 + $0x20] sm:$0xff]  ;;  %v495_v11 = vld [vmem:[#allocation5 + $0x30] sm:$0xff]  ;;  %vm872_vm2 = vcmask 130048  }
  0x76   : > { %v1191_v9 = vpack.c.bf16 %v496_v7, %v494_v6  ;;  %1188 = vmatprep.subr.bf16.mxu1 %v1187_v4  ;;  %v691_v12 = vld [vmem:[#allocation7 + $0x8] sm:$0xff]  ;;  %v690_v13 = vld [vmem:[#allocation7] sm:$0xff]  ;;  %v488_v14 = vld [vmem:[%s396_s22] sm:$0xff]  ;;  %v1193_v15 = vpack.c.bf16 %v495_v11, %v493_v10  ;;  %s1112_s26 = sshll.u32 %s1546_s12, 7  ;;  %s456_s16 = scalar_lea.vmem [#allocation8], %s1099_s29 }
  0x77   : > { %s1104_s19 = sshll.u32 %s1815_s21, 3  ;;  %1190 = vmatpush1.bf16.msra.mxu1 %v1189_v8  ;;  %696 = vmatprep.subr.mxu0 %v691_v12  ;;  %v603_v16 = vld [vmem:[%s2114_s6 + $0x80] sm:$0xff]  ;;  %v604_v17 = vld [vmem:[%s2114_s6 + $0x88] sm:$0xff]  ;;  %v605_v26 = vld [vmem:[%s2114_s6 + $0x90] sm:$0xff]  ;;  %s1105_s17 = sshll.u32 %s1815_s21, 1 }
  0x78   : > { %v587_v18 = vld [vmem:[%s2114_s6] sm:$0xff]  ;;  %1192 = vmatprep.subr.bf16.mxu1 %v1191_v9  ;;  %697 = vmatpush1.msra.mxu0 %v690_v13  ;;  %v1195_v19 = vpack.c.bf16 %v604_v17, %v603_v16  ;;  %v588_v20 = vld [vmem:[%s2114_s6 + $0x8] sm:$0xff]  ;;  %v606_v29 = vld [vmem:[%s2114_s6 + $0x98] sm:$0xff]  ;;  %s474_s9 = scalar_lea.vmem %s2109_s1, %s1105_s17  ;;  %s1116_s28 = sshll.u32 %s1815_s21, 4 }
  0x79   : > { %v785_v21 = vld [vmem:[%s2115_s7 + $0x80] sm:$0xff]  ;;  %v786_v22 = vld [vmem:[%s2115_s7 + $0x88] sm:$0xff]  ;;  %1109 = vmatmul.mubr.msk.f32.vlgmr.msra.gmra.mrb[0].mxu0 %vm692_vm0, %v488_v14  ;;  %v1197_v30 = vpack.c.bf16 %v588_v20, %v587_v18  ;;  %v787_v31 = vld [vmem:[%s2115_s7 + $0x90] sm:$0xff]  ;;  %v1199_v34 = vpack.c.bf16 %v606_v29, %v605_v26  ;;  %s483_s27 = scalar_lea.vmem %s2110_s2, %s1116_s28  ;;  %s1103_s21 = sshll.u32 %s1799_s20, 2 }
  0x7a   : > { %s470_s23 = scalar_lea.vmem %s2141_s0, %s1104_s19  ;;  %v1227_v23 = vpack.c.bf16 %v786_v22, %v785_v21  ;;  %v769_v24 = vld [vmem:[%s2115_s7] sm:$0xff]  ;;  %v770_v25 = vld [vmem:[%s2115_s7 + $0x8] sm:$0xff]  ;;  %v788_v32 = vld [vmem:[%s2115_s7 + $0x98] sm:$0xff]  ;;  %s896_s22 = sshll.u32 %s456_s16, 4  ;;  %s2032_s22 = int_to_ptr.vmem [resolvable:$true] %s896_s22 }
  0x7b   : > { %v484_v27 = vld [vmem:[%s470_s23] sm:$0xff]  ;;  %v1229_v28 = vpack.c.bf16 %v770_v25, %v769_v24  ;;  %1194 = vmatpush1.bf16.msra.mxu1 %v1193_v15  ;;  %v771_v33 = vld [vmem:[%s2115_s7 + $0x10] sm:$0xff]  ;;  %v590_v36 = vld [vmem:[%s2114_s6 + $0x18] sm:$0xff]  ;;  %v1231_v37 = vpack.c.bf16 %v788_v32, %v787_v31  ;;  %s1113_s19 = sshll.u32 %s1546_s12, 6  ;;  %s463_s17 = scalar_lea.vmem [#allocation9], %s1103_s21 }
  0x7c   : > { %1228 = vmatprep.subr.bf16.mxu0 %v1227_v23  ;;  %1196 = vmatprep.subr.bf16.mxu1 %v1195_v19  ;;  %v589_v35 = vld [vmem:[%s2114_s6 + $0x10] sm:$0xff]  ;;  %v772_v38 = vld [vmem:[%s2115_s7 + $0x18] sm:$0xff]  ;;  %v607_v40 = vld [vmem:[%s2114_s6 + $0xa0] sm:$0xff]  ;;  %s910_s25 = sshll.u32 %s463_s17, 4  ;;  %s2142_s28 = sld [smem:[#allocation18_spill]]  ;;  %s2039_s25 = int_to_ptr.vmem [resolvable:$true] %s910_s25 }
  0x7d   : > { %1230 = vmatpush3.bf16.msra.mxu0 %v1229_v28  ;;  %v1233_v39 = vpack.c.bf16 %v772_v38, %v771_v33  ;;  %v608_v41 = vld [vmem:[%s2114_s6 + $0xa8] sm:$0xff]  ;;  %v789_v42 = vld [vmem:[%s2115_s7 + $0xa0] sm:$0xff]  ;;  %v1201_v46 = vpack.c.bf16 %v590_v36, %v589_v35  ;;  %v609_v52 = vld [vmem:[%s2114_s6 + $0xb0] sm:$0xff]  ;;  %s877_s12 = scalar_lea.sflag [#allocation4], %s1799_s20  ;;  %s1436_s21 = scalar_lea.vmem %s2032_s22, 128 }
  0x7e   : > { %1108 = vmatmul.mubr.msk.f32.vlgmr.msra.gmra.mrb[0].mxu1 %vm508_vm1, %v484_v27  ;;  %1232 = vmatprep.subr.bf16.mxu0 %v1231_v37  ;;  %v790_v43 = vld [vmem:[%s2115_s7 + $0xa8] sm:$0xff]  ;;  %v773_v44 = vld [vmem:[%s2115_s7 + $0x20] sm:$0xff]  ;;  %v1203_v50 = vpack.c.bf16 %v608_v41, %v607_v40  ;;  %v791_v53 = vld [vmem:[%s2115_s7 + $0xb0] sm:$0xff]  ;;  %p1437_p12 = scmp.ne.s32.totalorder %s2032_s22, %s1436_s21  ;;  %p2144_p1 = scmp.ne.s32.totalorder %s2137_s24, 0 }
  0x7f   : > { %v774_v45 = vld [vmem:[%s2115_s7 + $0x28] sm:$0xff]  ;;  %1198 = vmatpush3.bf16.msra.mxu1 %v1197_v30  ;;  %v591_v47 = vld [vmem:[%s2114_s6 + $0x20] sm:$0xff]  ;;  %v1235_v49 = vpack.c.bf16 %v790_v43, %v789_v42  ;;  %v792_v54 = vld [vmem:[%s2115_s7 + $0xb8] sm:$0xff] }
  0x80   : > { %v592_v48 = vld [vmem:[%s2114_s6 + $0x28] sm:$0xff]  ;;  %1200 = vmatprep.subr.bf16.mxu1 %v1199_v34  ;;  %v1237_v51 = vpack.c.bf16 %v774_v45, %v773_v44  ;;  %v610_v55 = vld [vmem:[%s2114_s6 + $0xb8] sm:$0xff]  ;;  %v1239_v56 = vpack.c.bf16 %v792_v54, %v791_v53  ;;  %v775_v57 = vld [vmem:[%s2115_s7 + $0x30] sm:$0xff]  ;;  %p1438_p10 = pnand %p1437_p12, %p2144_p1 }
  0x81   : > { %1234 = vmatpush3.bf16.msra.mxu0 %v1233_v39  ;;  %v776_v58 = vld [vmem:[%s2115_s7 + $0x38] sm:$0xff]  ;;  %v1205_v59 = vpack.c.bf16 %v592_v48, %v591_v47  ;;  %v793_v60 = vld [vmem:[%s2115_s7 + $0xc0] sm:$0xff]  ;;  %v794_v61 = vld [vmem:[%s2115_s7 + $0xc8] sm:$0xff]  ;;  %v1207_v62 = vpack.c.bf16 %v610_v55, %v609_v52 }
  0x82   : > { %1236 = vmatprep.subr.bf16.mxu0 %v1235_v49  ;;  %v593_v63 = vld [vmem:[%s2114_s6 + $0x30] sm:$0xff]  ;;  %v594_v0 = vld [vmem:[%s2114_s6 + $0x38] sm:$0xff]  ;;  %v1241_v1 = vpack.c.bf16 %v776_v58, %v775_v57  ;;  %v611_v2 = vld [vmem:[%s2114_s6 + $0xc0] sm:$0xff]  ;;  %v1243_v4 = vpack.c.bf16 %v794_v61, %v793_v60  ;;  %v498_v49 = vlaneseq  ;;  %s2030_s18 = scalar_lea.hbm %s2142_s28, %s1112_s26  ;;  %p1439_p3 = pneg %p1438_p10 }
  0x83   : > { %1202 = vmatpush3.bf16.msra.mxu1 %v1201_v46  ;;  %v612_v3 = vld [vmem:[%s2114_s6 + $0xc8] sm:$0xff]  ;;  %v777_v5 = vld [vmem:[%s2115_s7 + $0x40] sm:$0xff]  ;;  %v795_v7 = vld [vmem:[%s2115_s7 + $0xd0] sm:$0xff]  ;;  %v1209_v9 = vpack.c.bf16 %v594_v0, %v593_v63  ;;  %s1562_s26 = smov [#allocation8]  }
  0x84   : > { %1204 = vmatprep.subr.bf16.mxu1 %v1203_v50  ;;  %v778_v6 = vld [vmem:[%s2115_s7 + $0x48] sm:$0xff]  ;;  %v796_v8 = vld [vmem:[%s2115_s7 + $0xd8] sm:$0xff]  ;;  %v1211_v10 = vpack.c.bf16 %v612_v3, %v611_v2  ;;  %v595_v11 = vld [vmem:[%s2114_s6 + $0x40] sm:$0xff]  ;;  %v499_v50 = vshrl.u32 %v498_v49, 7  ;;  %s1440_s8 = sshll.u32 %s1562_s26, 4  ;;  %s1441_s8 = int_to_ptr.vmem [resolvable:$false] %s1440_s8 }
  0x85   : > { %1238 = vmatpush3.bf16.msra.mxu0 %v1237_v51  ;;  %v596_v12 = vld [vmem:[%s2114_s6 + $0x48] sm:$0xff]  ;;  %v1245_v13 = vpack.c.bf16 %v778_v6, %v777_v5  ;;  %v613_v14 = vld [vmem:[%s2114_s6 + $0xd0] sm:$0xff]  ;;  %v614_v15 = vld [vmem:[%s2114_s6 + $0xd8] sm:$0xff]  ;;  %v1247_v16 = vpack.c.bf16 %v796_v8, %v795_v7  ;;  %p1443_p5 = scmp.lt.s32.totalorder %s2032_s22, %s1441_s8 }
  0x86   : > { %1240 = vmatprep.subr.bf16.mxu0 %v1239_v56  ;;  %v1213_v17 = vpack.c.bf16 %v596_v12, %v595_v11  ;;  %v1215_v18 = vpack.c.bf16 %v614_v15, %v613_v14  ;;  %v597_v19 = vld [vmem:[%s2114_s6 + $0x50] sm:$0xff]  ;;  %v598_v20 = vld [vmem:[%s2114_s6 + $0x58] sm:$0xff]  ;;  %v615_v25 = vld [vmem:[%s2114_s6 + $0xe0] sm:$0xff]  ;;  %v500_v51 = vsub.s32 0, %v499_v50  ;;  %v504_v53 = vsub.s32 1, %v499_v50 }
  0x87   : > { %1206 = vmatpush3.bf16.msra.mxu1 %v1205_v59  ;;  %v1217_v21 = vpack.c.bf16 %v598_v20, %v597_v19  ;;  %v779_v22 = vld [vmem:[%s2115_s7 + $0x50] sm:$0xff]  ;;  %v780_v23 = vld [vmem:[%s2115_s7 + $0x58] sm:$0xff]  ;;  %v616_v26 = vld [vmem:[%s2114_s6 + $0xe8] sm:$0xff] }
  0x88   : > { %1208 = vmatprep.subr.bf16.mxu1 %v1207_v62  ;;  %v1249_v24 = vpack.c.bf16 %v780_v23, %v779_v22  ;;  %v1219_v27 = vpack.c.bf16 %v616_v26, %v615_v25  ;;  %v599_v28 = vld [vmem:[%s2114_s6 + $0x60] sm:$0xff]  ;;  %v600_v29 = vld [vmem:[%s2114_s6 + $0x68] sm:$0xff]  ;;  %v617_v37 = vld [vmem:[%s2114_s6 + $0xf0] sm:$0xff] }
  0x89   : > { %1242 = vmatpush3.bf16.msra.mxu0 %v1241_v1  ;;  %v1221_v30 = vpack.c.bf16 %v600_v29, %v599_v28  ;;  %v797_v31 = vld [vmem:[%s2115_s7 + $0xe0] sm:$0xff]  ;;  %v798_v32 = vld [vmem:[%s2115_s7 + $0xe8] sm:$0xff]  ;;  %v618_v38 = vld [vmem:[%s2114_s6 + $0xf8] sm:$0xff] }
  0x8a   : > { %1244 = vmatprep.subr.bf16.mxu0 %v1243_v4  ;;  %v1251_v33 = vpack.c.bf16 %v798_v32, %v797_v31  ;;  %v781_v34 = vld [vmem:[%s2115_s7 + $0x60] sm:$0xff]  ;;  %v782_v35 = vld [vmem:[%s2115_s7 + $0x68] sm:$0xff]  ;;  %v1223_v39 = vpack.c.bf16 %v618_v38, %v617_v37  ;;  %v601_v40 = vld [vmem:[%s2114_s6 + $0x70] sm:$0xff] }
  0x8b   : > { %1210 = vmatpush3.bf16.msra.mxu1 %v1209_v9  ;;  %v1253_v36 = vpack.c.bf16 %v782_v35, %v781_v34  ;;  %v602_v41 = vld [vmem:[%s2114_s6 + $0x78] sm:$0xff]  ;;  %v799_v43 = vld [vmem:[%s2115_s7 + $0xf0] sm:$0xff]  ;;  %v485_v52 = vld [vmem:[%s474_s9] sm:$0x3]  ;;  %s1442_s9 = scalar_lea.vmem %s1441_s8, 256 }
  0x8c   : > { %1212 = vmatprep.subr.bf16.mxu1 %v1211_v10  ;;  %v1225_v42 = vpack.c.bf16 %v602_v41, %v601_v40  ;;  %v800_v44 = vld [vmem:[%s2115_s7 + $0xf8] sm:$0xff]  ;;  %v783_v46 = vld [vmem:[%s2115_s7 + $0x70] sm:$0xff]  ;;  %v501_v56 = vrot.slane %v485_v52, %v500_v51  ;;  %v505_v57 = vrot.slane %v485_v52, %v504_v53  ;;  %v486_v58 = vld [vmem:[%s483_s27] sm:$0xff]  ;;  %p1444_p9 = scmp.lt.s32.totalorder %s1442_s9, %s1436_s21 }
  0x8d   : > { %1246 = vmatpush3.bf16.msra.mxu0 %v1245_v13  ;;  %v1255_v45 = vpack.c.bf16 %v800_v44, %v799_v43  ;;  %v784_v47 = vld [vmem:[%s2115_s7 + $0x78] sm:$0xff]  ;;  %v487_v61 = vld [vmem:[%s483_s27 + $0x8] sm:$0xff]  ;;  %s2143_s27 = sld [smem:[#allocation19_spill]] }
  0x8e   : > { %1248 = vmatprep.subr.bf16.mxu0 %v1247_v16  ;;  %v1257_v48 = vpack.c.bf16 %v784_v47, %v783_v46  ;;  %p1445_p11 = por %p1444_p9, %p1443_p5 }
  0x8f   : > { %1214 = vmatpush3.bf16.msra.mxu1 %v1213_v17 }
  0x90   : > { %1216 = vmatprep.subr.bf16.mxu1 %v1215_v18  ;;  %p1446_p0 = pnand %p1445_p11, %p1439_p3 }
  0x91   : > { %1250 = vmatpush3.bf16.msra.mxu0 %v1249_v24 }
  0x92   : > { %1252 = vmatprep.subr.bf16.mxu0 %v1251_v33 }
  0x93   : > { %1218 = vmatpush3.bf16.msra.mxu1 %v1217_v21  ;;  %s2037_s0 = scalar_lea.hbm %s2143_s27, %s1113_s19 }
  0x94   : > { %1220 = vmatprep.subr.bf16.mxu1 %v1219_v27 }
  0x95   : > { %1254 = vmatpush3.bf16.msra.mxu0 %v1253_v36 }
  0x96   : > { %1256 = vmatprep.subr.bf16.mxu0 %v1255_v45 }
  0x97   : > { %1222 = vmatpush3.bf16.msra.mxu1 %v1221_v30 }
  0x98   : > { %1224 = vmatprep.subr.bf16.mxu1 %v1223_v39 }
  0x99   : > { %1258 = vmatpush3.bf16.msra.mxu0 %v1257_v48 }
  0x9b   : > { %1226 = vmatpush3.bf16.msra.mxu1 %v1225_v42 }
 0x14c   : > { %v762_v54 = vpop.f32.mrb[0].mxu0 }
 0x14d   : > { %v764_v55 = vpop.f32.mrb[1].mxu0 }
 0x151   : > { %v578_v59 = vpop.f32.mrb[0].mxu1 }
 0x152   : > { %v579_v60 = vadd.f32 %v578_v59, %v501_v56  ;;  %v580_v62 = vpop.f32.mrb[1].mxu1 }
 0x153   : > { %v581_v63 = vadd.f32 %v580_v62, %v505_v57 }
 0x154   : > { %v583_v0 = vadd.f32 %v579_v60, %v486_v58 }
 0x155   : > { %v584_v1 = vadd.f32 %v581_v63, %v487_v61 }
 0x156   : > { %v585_v2 = vmax.f32 %v583_v0, 0.0 }
 0x157   : > { %v586_v3 = vmax.f32 %v584_v1, 0.0 }
 0x158   : > { %v767_v4 = vmul.f32 %v762_v54, %v585_v2 }
 0x159   : > { %v768_v5 = vmul.f32 %v764_v55, %v586_v3  ;;  %683 = vmatprep.mubr.f32.mxu1 %v586_v3 }
 0x15a   : > { %684 = vmatmul.mubr.f32.vlgmr.msra.gmra.mrb[2].mxu1 %v585_v2 }
 0x15b   : > { %865 = vmatprep.mubr.f32.mxu0 %v768_v5 }
 0x15c   : > { %866 = vmatmul.mubr.f32.vlgmr.msra.gmra.mrb[2].mxu0 %v767_v4 }
 0x22d   : > { %v1149_v6 = vpop.f32.mrb[2].mxu1 }
 0x22e   : > { %v1150_v7 = vpop.f32.mrb[3].mxu1 }
 0x22f   : > { %v1151_v8 = vadd.f32 %v1150_v7, %v1149_v6  ;;  %v1184_v9 = vpop.f32.mrb[2].mxu0 }
 0x230   : > { %v1185_v10 = vpop.f32.mrb[3].mxu0 }
 0x231   : > { %v689_v11 = vmax.f32 %v1151_v8, 0.0  ;;  %v1186_v12 = vadd.f32 %v1185_v10, %v1184_v9 }
 0x233   : > { %v874_v13 = vpack.c.bf16 %v689_v11, %v689_v11  ;;  %v871_v14 = vmax.f32 %v1186_v12, 0.0 }
 0x235   : > { %873 = vst.msk [vmem:[%s456_s16] sm:$0xff] %vm872_vm2, %v871_v14  ;;  %875 = vst [vmem:[%s463_s17] sm:$0xf] %v874_v13 }
 0x236   : > { %1449 = shalt.err (!%p1446_p0)
}
 0x237   : > { %s1450_s16 = scalar_lea.hbm %s2030_s18, 128  ;;  %s1454_s23 = scalar_lea.hbm %s2142_s28, 256 }
 0x238   : > { %p1451_p4 = scmp.ne.s32.totalorder %s2030_s18, %s1450_s16  ;;  %p1455_p7 = scmp.lt.u32.totalorder %s2030_s18, %s2142_s28 }
 0x239   : > { %p1456_p2 = scmp.lt.u32.totalorder %s1454_s23, %s1450_s16  ;;  %p1458_p12 = scmp.lt.u32.totalorder %s1450_s16, %s2030_s18 }
 0x23a   : > { %p1452_p13 = pnand %p1451_p4, %p2144_p1 }
 0x23b   : > { %p1457_p8 = por %p1456_p2, %p1455_p7 }
 0x23c   : > { %p1453_p6 = pneg %p1452_p13 }
 0x23d   : > { %p1459_p10 = por %p1458_p12, %p1457_p8 }
 0x23f   : > { %p1460_p3 = pnand %p1459_p10, %p1453_p6 }
 0x241   : > { %1463 = shalt.err (!%p1460_p3)
}
 0x242   : > { %1269 = dma.vmem_to_hbm [thread:$0]  (%p2144_p1), %s2032_s22, 128, %s2030_s18, %s877_s12  }
 0x243   : > { %s882_s21 = scalar_lea.sflag [#allocation10], %s1799_s20  ;;  %s1464_s8 = scalar_lea.vmem %s2039_s25, 64 }
 0x244   : > { %p1465_p5 = scmp.ne.s32.totalorder %s2039_s25, %s1464_s8  ;;  %s1563_s9 = smov [#allocation9]  }
 0x245   : > { %s1468_s16 = sshll.u32 %s1563_s9, 4  ;;  %s1469_s16 = int_to_ptr.vmem [resolvable:$false] %s1468_s16 }
 0x246   : > { %p1466_p9 = pnand %p1465_p5, %p2144_p1  ;;  %s1470_s19 = scalar_lea.vmem %s1469_s16, 128 }
 0x247   : > { %p1471_p0 = scmp.lt.s32.totalorder %s2039_s25, %s1469_s16  ;;  %p1472_p4 = scmp.lt.s32.totalorder %s1470_s19, %s1464_s8 }
 0x248   : > { %p1467_p11 = pneg %p1466_p9 }
 0x249   : > { %p1473_p13 = por %p1472_p4, %p1471_p0 }
 0x24b   : > { %p1474_p6 = pnand %p1473_p13, %p1467_p11 }
 0x24d   : > { %1477 = shalt.err (!%p1474_p6)
}
 0x24e   : > { %s1478_s20 = scalar_lea.hbm %s2037_s0, 64  ;;  %s1482_s12 = scalar_lea.hbm %s2143_s27, 128 }
 0x24f   : > { %p1479_p7 = scmp.ne.s32.totalorder %s2037_s0, %s1478_s20  ;;  %p1483_p12 = scmp.lt.u32.totalorder %s2037_s0, %s2143_s27 }
 0x250   : > { %p1484_p10 = scmp.lt.u32.totalorder %s1482_s12, %s1478_s20  ;;  %p1486_p5 = scmp.lt.u32.totalorder %s1478_s20, %s2037_s0 }
 0x251   : > { %p1480_p2 = pnand %p1479_p7, %p2144_p1 }
 0x252   : > { %p1485_p3 = por %p1484_p10, %p1483_p12 }
 0x253   : > { %p1481_p8 = pneg %p1480_p2 }
 0x254   : > { %p1487_p9 = por %p1486_p5, %p1485_p3 }
 0x256   : > { %p1488_p11 = pnand %p1487_p9, %p1481_p8 }
 0x258   : > { %1491 = shalt.err (!%p1488_p11)
}
 0x259   : > { %1270 = dma.vmem_to_hbm [thread:$0]  (%p2144_p1), %s2039_s25, 64, %s2037_s0, %s882_s21  }
 0x25a PF: > { %s2145_s29 = sld [smem:[#allocation15_spill]]  ;;  %s2146_s26 = sld [smem:[#allocation16_spill]] }
 0x25b   : > { %p2148_p4 = scmp.ge.s32.totalorder %s1554_s14, 2 }
 0x260   : > { %s922_s8 = sand.u32 1, %s2145_s29   ;;  %p2147_p0 = scmp.ne.s32.totalorder %s2146_s26, 0 }
 0x261   : > { %s923_s9 = scalar_lea.sflag [#allocation4], %s922_s8 }
 0x262   : > { %p1285_p13 = pnand %p2148_p4, %p2147_p0 }
 0x264   : > { %1525 = dma.done.wait (!%p1285_p13), %s923_s9, 128  }
 0x265   : > { %1527 = vsyncadd (!%p1285_p13), %s923_s9, 4294967168  ;;  %s932_s16 = scalar_lea.sflag [#allocation10], %s922_s8 }
 0x266   : > { %1529 = dma.done.wait (!%p1285_p13), %s932_s16, 64  }
 0x267   : > { %1531 = vsyncadd (!%p1285_p13), %s932_s16, 4294967232  ;;  %s30_s14 = sadd.s32 1, %s1554_s14   ;;  %s2149_s0 = smov %s2156_s30 }
 0x268   : > { %p27_p6 = scmp.ge.s32.totalorder %s30_s14, 4   ;;  %s2150_s30 = smov %s1538_s10 }
 0x269   : > { %s2151_s10 = smov %s1542_s11  ;;  %s2152_s11 = smov %s1756_s15 }
 0x26a   : > { %s2153_s12 = smov %s1550_s13  ;;  %s2154_s13 = smov %s2149_s0 }
 0x26b   :  { %29 = sbr.rel (!%p27_p6) target bundleno = 13 (0xd), region = 131 }
 0x272   :  { %937 = vsyncpa [#allocation3], 1 }
 0x273   :  { %939 = vsyncpa [#allocation3 + $0x1], 1 }
 0x274   :  { %940 = vsyncpa [#allocation6], 1 }
 0x275   :  { %941 = vsyncpa [#allocation4], 1 }
 0x276   :  { %943 = vsyncpa [#allocation4 + $0x1], 1 }
 0x277   :  { %944 = vsyncpa [#allocation10], 1 }
 0x278   :  { %946 = vsyncpa [#allocation10 + $0x1], 1 }

</bundles_post_ra>
